<compile_context>
chip_gen: v7x
topology: tpu7x:2x2x1
jax: 0.10.0
libtpu: 0.0.40
codegen_flags: <defaults>
</compile_context>

<pallas_src>
import jax
import jax.numpy as jnp
from jax import lax
from jax.experimental import pallas as pl
from jax.experimental.pallas import tpu as pltpu


def _make_kernel(TB, S, E, C_pad, F, max_fs, compute_dtype):
    NR = TB * S                                  # rows of the flattened [TB*S, E] block

    def _shift_up(x, k, axis):
        # result[..., i, ...] = x[..., i + k, ...]  (wrap-around; wrapped values only
        # land in positions the static masks zero before the max-pool).
        # Lowers to XLU sublane/lane rotates + selects.
        if k == 0:
            return x
        n = x.shape[axis]
        hi = lax.slice_in_dim(x, k, n, axis=axis)
        lo = lax.slice_in_dim(x, 0, k, axis=axis)
        return lax.concatenate([hi, lo], dimension=axis)

    def kernel(tok_ref, table_hbm, w_ref, bias_ref, tapmask_ref, seqmask_ref,
               out_ref, emb_buf, dma_sem):
        blk = pl.program_id(0)

        # ---- fused embedding gather: SMEM token ids -> per-row HBM->VMEM DMAs ----
        copies = []
        for r in range(NR):                                    # static unroll (NR small)
            tok = tok_ref[blk * TB + r // S, r % S]            # scalar reads before waits
            cp = pltpu.make_async_copy(table_hbm.at[pl.ds(tok, 1)],
                                       emb_buf.at[pl.ds(r, 1)],
                                       dma_sem.at[0])
            cp.start()
            copies.append(cp)
        for cp in copies:
            cp.wait()

        # ---- ONE lane-dense MXU matmul covering every (bank, tap) at once ----
        emb = emb_buf[...].astype(compute_dtype)               # bf16 operand (lossless,
        y = jnp.dot(emb, w_ref[...],                           # table pre-quantized)
                    preferred_element_type=jnp.float32)        # [NR, C_pad] f32

        # ---- tap combine: conv[:, l, base_i+f] = sum_k y[:, l+k, base_i + k*F + f] ----
        tapmask = tapmask_ref[...]                             # [max_fs, C_pad]
        acc = y                                                # k == 0 term
        for k in range(1, max_fs):
            z = _shift_up(y, k, axis=0)                        # sequence shift (sublanes)
            z = _shift_up(z, k * F, axis=1)                    # tap -> bank lane alignment
            acc = acc + z * tapmask[k:k + 1, :]                # only banks with fs > k
        acc = jnp.maximum(acc + bias_ref[...], 0.0)            # conv bias + ReLU (f32)

        # ---- zero positions past each bank's valid conv length, then max-pool ----
        acc = acc.reshape(TB, S, C_pad) * seqmask_ref[...].reshape(1, S, C_pad)
        out_ref[...] = jnp.max(acc, axis=1)                    # [TB, C_pad] dense store

    return kernel


def cnn_forward(tokens, emb_table, conv_ws, conv_bs, fc_w, fc_b,
                filter_sizes, n_filters):
    """Eval-mode forward of the text CNN (dropout == identity)."""
    filter_sizes = tuple(int(f) for f in filter_sizes)
    B, S = tokens.shape
    _, E = emb_table.shape
    F = int(n_filters)
    max_fs = max(filter_sizes)
    C = sum(filter_sizes) * F                      # one column per (bank, tap, filter)
    C_pad = ((C + 127) // 128) * 128               # lane-dense MXU output width

    compute_dtype = jnp.bfloat16
    # Quantize the frozen table once so the in-kernel bf16 operand cast is exact.
    emb_table = emb_table.astype(compute_dtype).astype(jnp.float32)

    # ---- host-side packing: fused conv weights, bias, masks, folded FC weight ----
    w_all = jnp.zeros((E, C_pad), jnp.float32)
    bias_all = jnp.zeros((1, C_pad), jnp.float32)
    tapmask = jnp.zeros((max_fs, C_pad), jnp.float32)   # tapmask[k]: banks with fs > k
    seqmask = jnp.zeros((S, C_pad), jnp.float32)        # valid conv positions per bank
    fc_packed = jnp.zeros((C_pad, 1), jnp.float32)      # Linear weight, concat folded
    base = 0
    for i, fs in enumerate(filter_sizes):
        w = conv_ws[i]                                   # [fs, E, F]
        for k in range(fs):
            w_all = w_all.at[:, base + k * F:base + (k + 1) * F].set(w[k])
            tapmask = tapmask.at[k, base:base + F].set(1.0)
        bias_all = bias_all.at[0, base:base + F].set(conv_bs[i].reshape(F))
        fc_packed = fc_packed.at[base:base + F, 0].set(fc_w[i * F:(i + 1) * F, 0])
        seqmask = seqmask.at[:S - fs + 1, base:base + F].set(1.0)
        base += fs * F
    w_all = w_all.astype(compute_dtype)                  # bf16 MXU operand storage

    TB = 8 if B % 8 == 0 else B                          # batch block (sublane multiple
    assert B % TB == 0                                   # when possible; pipelines at
    grid = (B // TB,)                                    # larger B, splits across cores)

    kernel = _make_kernel(TB, S, E, C_pad, F, max_fs, compute_dtype)

    pooled = pl.pallas_call(
        kernel,
        out_shape=jax.ShapeDtypeStruct((B, C_pad), jnp.float32),
        grid_spec=pltpu.PrefetchScalarGridSpec(
            num_scalar_prefetch=1,                                 # tokens -> SMEM
            grid=grid,
            in_specs=[
                pl.BlockSpec(memory_space=pl.ANY),                 # embedding table (HBM)
                pl.BlockSpec((E, C_pad), lambda i, tok: (0, 0)),         # fused conv weights
                pl.BlockSpec((1, C_pad), lambda i, tok: (0, 0)),         # conv bias
                pl.BlockSpec((max_fs, C_pad), lambda i, tok: (0, 0)),    # tap lane masks
                pl.BlockSpec((S, C_pad), lambda i, tok: (0, 0)),         # valid-length masks
            ],
            out_specs=pl.BlockSpec((TB, C_pad), lambda i, tok: (i, 0)),
            scratch_shapes=[
                pltpu.VMEM((TB * S, E), jnp.float32),              # gathered embedding rows
                pltpu.SemaphoreType.DMA((1,)),
            ],
        ),
        compiler_params=pltpu.CompilerParams(
            dimension_semantics=("parallel",),
            vmem_limit_bytes=32 * 1024 * 1024,
        ),
    )(tokens, emb_table, w_all, bias_all, tapmask, seqmask)

    # Final Linear: concat is already folded into lanes -> one tiny dense dot.
    return jnp.dot(pooled, fc_packed, precision=lax.Precision.HIGHEST) + fc_b


def _reference_forward(tokens, emb_table, conv_ws, conv_bs, fc_w, fc_b, filter_sizes):
    # Pure-JAX reference using the same bf16 operand quantization as the kernel.
    emb = jnp.take(emb_table, tokens, axis=0)
    emb = emb.astype(jnp.bfloat16).astype(jnp.float32)
    _, S, _ = emb.shape
    pooled = []
    for fs, w, b in zip(filter_sizes, conv_ws, conv_bs):
        w = w.astype(jnp.bfloat16).astype(jnp.float32)            # [fs, E, F]
        L = S - fs + 1
        windows = jnp.stack([emb[:, k:k + L, :] for k in range(fs)], axis=2)  # [B,L,fs,E]
        conv = jnp.einsum("blke,kef->blf", windows, w,
                          precision=lax.Precision.HIGHEST) + b.reshape(1, 1, -1)
        pooled.append(jnp.max(jnp.maximum(conv, 0.0), axis=1))
    cat = jnp.concatenate(pooled, axis=1)                         # dropout = identity (eval)
    return jnp.dot(cat, fc_w, precision=lax.Precision.HIGHEST) + fc_b


if __name__ == "__main__":
    # Small, deterministic configuration consistent with the module's __init__.
    vocab_size, embedding_dim = 50, 32
    n_filters = 8
    filter_sizes = (3, 4, 5)
    B, S = 2, 16

    key = jax.random.PRNGKey(0)
    keys = jax.random.split(key, 4 + 2 * len(filter_sizes))

    # pre_embedding (frozen embedding table), shape [vocab_size, embedding_dim]
    emb_table = jax.random.normal(keys[0], (vocab_size, embedding_dim), jnp.float32)
    tokens = jax.random.randint(keys[1], (B, S), 0, vocab_size, dtype=jnp.int32)

    # Conv2d(1, n_filters, kernel_size=(fs, E)): torch weight [F, 1, fs, E], bias [F]
    conv_ws, conv_bs = [], []
    for i, fs in enumerate(filter_sizes):
        w_t = 0.1 * jax.random.normal(keys[2 + 2 * i],
                                      (n_filters, 1, fs, embedding_dim), jnp.float32)
        b_t = 0.1 * jax.random.normal(keys[3 + 2 * i], (n_filters,), jnp.float32)
        conv_ws.append(jnp.transpose(w_t[:, 0], (1, 2, 0)))   # -> [fs, E, F]
        conv_bs.append(b_t.reshape(1, n_filters))             # -> [1, F]

    # Linear(len(filter_sizes)*n_filters, 1): torch weight [1, in], bias [1]
    in_feat = len(filter_sizes) * n_filters
    fc_w_t = 0.1 * jax.random.normal(keys[-2], (1, in_feat), jnp.float32)
    fc_b_t = 0.1 * jax.random.normal(keys[-1], (1,), jnp.float32)
    fc_w = fc_w_t.T                                           # -> [in, 1]
    fc_b = fc_b_t.reshape(1, 1)                               # -> [1, 1]

    out = cnn_forward(tokens, emb_table, conv_ws, conv_bs, fc_w, fc_b,
                      filter_sizes, n_filters)
    out = jax.block_until_ready(out)

    ref = _reference_forward(tokens, emb_table, conv_ws, conv_bs, fc_w, fc_b,
                             filter_sizes)
    assert out.shape == (B, 1)
    assert jnp.allclose(out, ref, atol=1e-3, rtol=1e-3), (out, ref)

    print("KERNEL_OK")
</pallas_src>

<mosaic_0001>
module attributes {stable_mosaic.version = 11 : i64} {
  func.func @kernel(%arg0: i32, %arg1: memref<2x16xi32, #tpu.memory_space<smem>>, %arg2: memref<50x32xf32, #tpu.memory_space<any>>, %arg3: memref<32x128xbf16, #tpu.memory_space<vmem>>, %arg4: memref<1x128xf32, #tpu.memory_space<vmem>>, %arg5: memref<5x128xf32, #tpu.memory_space<vmem>>, %arg6: memref<16x128xf32, #tpu.memory_space<vmem>>, %arg7: memref<2x128xf32, #tpu.memory_space<vmem>>, %arg8: memref<32x32xf32, #tpu.memory_space<vmem>>, %arg9: memref<1x!tpu.dma_semaphore, #tpu.memory_space<semaphore_mem>>) attributes {dimension_semantics = [#tpu.dimension_semantics<parallel>], iteration_bounds = array<i64: 1>, scalar_prefetch = 1 : i64, scratch_operands = 2 : i64, tpu.core_type = #tpu.core_type<tc>, window_params = [{}, {pipeline_mode = #tpu.pipeline_mode<synchronous>, transform_indices = @transform_1, window_bounds = array<i64: 32, 128>}, {pipeline_mode = #tpu.pipeline_mode<synchronous>, transform_indices = @transform_2, window_bounds = array<i64: 1, 128>}, {pipeline_mode = #tpu.pipeline_mode<synchronous>, transform_indices = @transform_3, window_bounds = array<i64: 5, 128>}, {pipeline_mode = #tpu.pipeline_mode<synchronous>, transform_indices = @transform_4, window_bounds = array<i64: 16, 128>}, {transform_indices = @transform_5, window_bounds = array<i64: 2, 128>}]} {
    %c2_i32 = arith.constant 2 : i32
    %0 = arith.muli %arg0, %c2_i32 : i32
    %c0_i32 = arith.constant 0 : i32
    %1 = arith.addi %0, %c0_i32 : i32
    %2 = arith.index_cast %1 : i32 to index
    %c0 = arith.constant 0 : index
    %3 = memref.load %arg1[%2, %c0] : memref<2x16xi32, #tpu.memory_space<smem>>
    %c0_i32_0 = arith.constant 0 : i32
    %c0_i32_1 = arith.constant 0 : i32
    %4 = tpu.memref_slice %arg2[%3, %c0_i32_1] : memref<50x32xf32, #tpu.memory_space<any>> -> memref<1x32xf32, #tpu.memory_space<any>>
    %c0_i32_2 = arith.constant 0 : i32
    %c0_i32_3 = arith.constant 0 : i32
    %5 = tpu.memref_slice %arg8[%c0_i32_2, %c0_i32_3] : memref<32x32xf32, #tpu.memory_space<vmem>> -> memref<1x32xf32, #tpu.memory_space<vmem>>
    %6 = tpu.memref_slice %arg9[%c0_i32_0] : memref<1x!tpu.dma_semaphore, #tpu.memory_space<semaphore_mem>> -> memref<1x!tpu.dma_semaphore, #tpu.memory_space<semaphore_mem>>
    %7 = tpu.memref_squeeze %6 : memref<1x!tpu.dma_semaphore, #tpu.memory_space<semaphore_mem>> -> memref<!tpu.dma_semaphore, #tpu.memory_space<semaphore_mem>>
    tpu.enqueue_dma source(%4 : memref<1x32xf32, #tpu.memory_space<any>>) target(%5 : memref<1x32xf32, #tpu.memory_space<vmem>>) target_semaphore(%7 : memref<!tpu.dma_semaphore, #tpu.memory_space<semaphore_mem>>)
    %c2_i32_4 = arith.constant 2 : i32
    %8 = arith.muli %arg0, %c2_i32_4 : i32
    %c0_i32_5 = arith.constant 0 : i32
    %9 = arith.addi %8, %c0_i32_5 : i32
    %10 = arith.index_cast %9 : i32 to index
    %c1 = arith.constant 1 : index
    %11 = memref.load %arg1[%10, %c1] : memref<2x16xi32, #tpu.memory_space<smem>>
    %c0_i32_6 = arith.constant 0 : i32
    %c0_i32_7 = arith.constant 0 : i32
    %12 = tpu.memref_slice %arg2[%11, %c0_i32_7] : memref<50x32xf32, #tpu.memory_space<any>> -> memref<1x32xf32, #tpu.memory_space<any>>
    %c1_i32 = arith.constant 1 : i32
    %c0_i32_8 = arith.constant 0 : i32
    %13 = tpu.memref_slice %arg8[%c1_i32, %c0_i32_8] : memref<32x32xf32, #tpu.memory_space<vmem>> -> memref<1x32xf32, #tpu.memory_space<vmem>>
    %14 = tpu.memref_slice %arg9[%c0_i32_6] : memref<1x!tpu.dma_semaphore, #tpu.memory_space<semaphore_mem>> -> memref<1x!tpu.dma_semaphore, #tpu.memory_space<semaphore_mem>>
    %15 = tpu.memref_squeeze %14 : memref<1x!tpu.dma_semaphore, #tpu.memory_space<semaphore_mem>> -> memref<!tpu.dma_semaphore, #tpu.memory_space<semaphore_mem>>
    tpu.enqueue_dma source(%12 : memref<1x32xf32, #tpu.memory_space<any>>) target(%13 : memref<1x32xf32, #tpu.memory_space<vmem>>) target_semaphore(%15 : memref<!tpu.dma_semaphore, #tpu.memory_space<semaphore_mem>>)
    %c2_i32_9 = arith.constant 2 : i32
    %16 = arith.muli %arg0, %c2_i32_9 : i32
    %c0_i32_10 = arith.constant 0 : i32
    %17 = arith.addi %16, %c0_i32_10 : i32
    %18 = arith.index_cast %17 : i32 to index
    %c2 = arith.constant 2 : index
    %19 = memref.load %arg1[%18, %c2] : memref<2x16xi32, #tpu.memory_space<smem>>
    %c0_i32_11 = arith.constant 0 : i32
    %c0_i32_12 = arith.constant 0 : i32
    %20 = tpu.memref_slice %arg2[%19, %c0_i32_12] : memref<50x32xf32, #tpu.memory_space<any>> -> memref<1x32xf32, #tpu.memory_space<any>>
    %c2_i32_13 = arith.constant 2 : i32
    %c0_i32_14 = arith.constant 0 : i32
    %21 = tpu.memref_slice %arg8[%c2_i32_13, %c0_i32_14] : memref<32x32xf32, #tpu.memory_space<vmem>> -> memref<1x32xf32, #tpu.memory_space<vmem>>
    %22 = tpu.memref_slice %arg9[%c0_i32_11] : memref<1x!tpu.dma_semaphore, #tpu.memory_space<semaphore_mem>> -> memref<1x!tpu.dma_semaphore, #tpu.memory_space<semaphore_mem>>
    %23 = tpu.memref_squeeze %22 : memref<1x!tpu.dma_semaphore, #tpu.memory_space<semaphore_mem>> -> memref<!tpu.dma_semaphore, #tpu.memory_space<semaphore_mem>>
    tpu.enqueue_dma source(%20 : memref<1x32xf32, #tpu.memory_space<any>>) target(%21 : memref<1x32xf32, #tpu.memory_space<vmem>>) target_semaphore(%23 : memref<!tpu.dma_semaphore, #tpu.memory_space<semaphore_mem>>)
    %c2_i32_15 = arith.constant 2 : i32
    %24 = arith.muli %arg0, %c2_i32_15 : i32
    %c0_i32_16 = arith.constant 0 : i32
    %25 = arith.addi %24, %c0_i32_16 : i32
    %26 = arith.index_cast %25 : i32 to index
    %c3 = arith.constant 3 : index
    %27 = memref.load %arg1[%26, %c3] : memref<2x16xi32, #tpu.memory_space<smem>>
    %c0_i32_17 = arith.constant 0 : i32
    %c0_i32_18 = arith.constant 0 : i32
    %28 = tpu.memref_slice %arg2[%27, %c0_i32_18] : memref<50x32xf32, #tpu.memory_space<any>> -> memref<1x32xf32, #tpu.memory_space<any>>
    %c3_i32 = arith.constant 3 : i32
    %c0_i32_19 = arith.constant 0 : i32
    %29 = tpu.memref_slice %arg8[%c3_i32, %c0_i32_19] : memref<32x32xf32, #tpu.memory_space<vmem>> -> memref<1x32xf32, #tpu.memory_space<vmem>>
    %30 = tpu.memref_slice %arg9[%c0_i32_17] : memref<1x!tpu.dma_semaphore, #tpu.memory_space<semaphore_mem>> -> memref<1x!tpu.dma_semaphore, #tpu.memory_space<semaphore_mem>>
    %31 = tpu.memref_squeeze %30 : memref<1x!tpu.dma_semaphore, #tpu.memory_space<semaphore_mem>> -> memref<!tpu.dma_semaphore, #tpu.memory_space<semaphore_mem>>
    tpu.enqueue_dma source(%28 : memref<1x32xf32, #tpu.memory_space<any>>) target(%29 : memref<1x32xf32, #tpu.memory_space<vmem>>) target_semaphore(%31 : memref<!tpu.dma_semaphore, #tpu.memory_space<semaphore_mem>>)
    %c2_i32_20 = arith.constant 2 : i32
    %32 = arith.muli %arg0, %c2_i32_20 : i32
    %c0_i32_21 = arith.constant 0 : i32
    %33 = arith.addi %32, %c0_i32_21 : i32
    %34 = arith.index_cast %33 : i32 to index
    %c4 = arith.constant 4 : index
    %35 = memref.load %arg1[%34, %c4] : memref<2x16xi32, #tpu.memory_space<smem>>
    %c0_i32_22 = arith.constant 0 : i32
    %c0_i32_23 = arith.constant 0 : i32
    %36 = tpu.memref_slice %arg2[%35, %c0_i32_23] : memref<50x32xf32, #tpu.memory_space<any>> -> memref<1x32xf32, #tpu.memory_space<any>>
    %c4_i32 = arith.constant 4 : i32
    %c0_i32_24 = arith.constant 0 : i32
    %37 = tpu.memref_slice %arg8[%c4_i32, %c0_i32_24] : memref<32x32xf32, #tpu.memory_space<vmem>> -> memref<1x32xf32, #tpu.memory_space<vmem>>
    %38 = tpu.memref_slice %arg9[%c0_i32_22] : memref<1x!tpu.dma_semaphore, #tpu.memory_space<semaphore_mem>> -> memref<1x!tpu.dma_semaphore, #tpu.memory_space<semaphore_mem>>
    %39 = tpu.memref_squeeze %38 : memref<1x!tpu.dma_semaphore, #tpu.memory_space<semaphore_mem>> -> memref<!tpu.dma_semaphore, #tpu.memory_space<semaphore_mem>>
    tpu.enqueue_dma source(%36 : memref<1x32xf32, #tpu.memory_space<any>>) target(%37 : memref<1x32xf32, #tpu.memory_space<vmem>>) target_semaphore(%39 : memref<!tpu.dma_semaphore, #tpu.memory_space<semaphore_mem>>)
    %c2_i32_25 = arith.constant 2 : i32
    %40 = arith.muli %arg0, %c2_i32_25 : i32
    %c0_i32_26 = arith.constant 0 : i32
    %41 = arith.addi %40, %c0_i32_26 : i32
    %42 = arith.index_cast %41 : i32 to index
    %c5 = arith.constant 5 : index
    %43 = memref.load %arg1[%42, %c5] : memref<2x16xi32, #tpu.memory_space<smem>>
    %c0_i32_27 = arith.constant 0 : i32
    %c0_i32_28 = arith.constant 0 : i32
    %44 = tpu.memref_slice %arg2[%43, %c0_i32_28] : memref<50x32xf32, #tpu.memory_space<any>> -> memref<1x32xf32, #tpu.memory_space<any>>
    %c5_i32 = arith.constant 5 : i32
    %c0_i32_29 = arith.constant 0 : i32
    %45 = tpu.memref_slice %arg8[%c5_i32, %c0_i32_29] : memref<32x32xf32, #tpu.memory_space<vmem>> -> memref<1x32xf32, #tpu.memory_space<vmem>>
    %46 = tpu.memref_slice %arg9[%c0_i32_27] : memref<1x!tpu.dma_semaphore, #tpu.memory_space<semaphore_mem>> -> memref<1x!tpu.dma_semaphore, #tpu.memory_space<semaphore_mem>>
    %47 = tpu.memref_squeeze %46 : memref<1x!tpu.dma_semaphore, #tpu.memory_space<semaphore_mem>> -> memref<!tpu.dma_semaphore, #tpu.memory_space<semaphore_mem>>
    tpu.enqueue_dma source(%44 : memref<1x32xf32, #tpu.memory_space<any>>) target(%45 : memref<1x32xf32, #tpu.memory_space<vmem>>) target_semaphore(%47 : memref<!tpu.dma_semaphore, #tpu.memory_space<semaphore_mem>>)
    %c2_i32_30 = arith.constant 2 : i32
    %48 = arith.muli %arg0, %c2_i32_30 : i32
    %c0_i32_31 = arith.constant 0 : i32
    %49 = arith.addi %48, %c0_i32_31 : i32
    %50 = arith.index_cast %49 : i32 to index
    %c6 = arith.constant 6 : index
    %51 = memref.load %arg1[%50, %c6] : memref<2x16xi32, #tpu.memory_space<smem>>
    %c0_i32_32 = arith.constant 0 : i32
    %c0_i32_33 = arith.constant 0 : i32
    %52 = tpu.memref_slice %arg2[%51, %c0_i32_33] : memref<50x32xf32, #tpu.memory_space<any>> -> memref<1x32xf32, #tpu.memory_space<any>>
    %c6_i32 = arith.constant 6 : i32
    %c0_i32_34 = arith.constant 0 : i32
    %53 = tpu.memref_slice %arg8[%c6_i32, %c0_i32_34] : memref<32x32xf32, #tpu.memory_space<vmem>> -> memref<1x32xf32, #tpu.memory_space<vmem>>
    %54 = tpu.memref_slice %arg9[%c0_i32_32] : memref<1x!tpu.dma_semaphore, #tpu.memory_space<semaphore_mem>> -> memref<1x!tpu.dma_semaphore, #tpu.memory_space<semaphore_mem>>
    %55 = tpu.memref_squeeze %54 : memref<1x!tpu.dma_semaphore, #tpu.memory_space<semaphore_mem>> -> memref<!tpu.dma_semaphore, #tpu.memory_space<semaphore_mem>>
    tpu.enqueue_dma source(%52 : memref<1x32xf32, #tpu.memory_space<any>>) target(%53 : memref<1x32xf32, #tpu.memory_space<vmem>>) target_semaphore(%55 : memref<!tpu.dma_semaphore, #tpu.memory_space<semaphore_mem>>)
    %c2_i32_35 = arith.constant 2 : i32
    %56 = arith.muli %arg0, %c2_i32_35 : i32
    %c0_i32_36 = arith.constant 0 : i32
    %57 = arith.addi %56, %c0_i32_36 : i32
    %58 = arith.index_cast %57 : i32 to index
    %c7 = arith.constant 7 : index
    %59 = memref.load %arg1[%58, %c7] : memref<2x16xi32, #tpu.memory_space<smem>>
    %c0_i32_37 = arith.constant 0 : i32
    %c0_i32_38 = arith.constant 0 : i32
    %60 = tpu.memref_slice %arg2[%59, %c0_i32_38] : memref<50x32xf32, #tpu.memory_space<any>> -> memref<1x32xf32, #tpu.memory_space<any>>
    %c7_i32 = arith.constant 7 : i32
    %c0_i32_39 = arith.constant 0 : i32
    %61 = tpu.memref_slice %arg8[%c7_i32, %c0_i32_39] : memref<32x32xf32, #tpu.memory_space<vmem>> -> memref<1x32xf32, #tpu.memory_space<vmem>>
    %62 = tpu.memref_slice %arg9[%c0_i32_37] : memref<1x!tpu.dma_semaphore, #tpu.memory_space<semaphore_mem>> -> memref<1x!tpu.dma_semaphore, #tpu.memory_space<semaphore_mem>>
    %63 = tpu.memref_squeeze %62 : memref<1x!tpu.dma_semaphore, #tpu.memory_space<semaphore_mem>> -> memref<!tpu.dma_semaphore, #tpu.memory_space<semaphore_mem>>
    tpu.enqueue_dma source(%60 : memref<1x32xf32, #tpu.memory_space<any>>) target(%61 : memref<1x32xf32, #tpu.memory_space<vmem>>) target_semaphore(%63 : memref<!tpu.dma_semaphore, #tpu.memory_space<semaphore_mem>>)
    %c2_i32_40 = arith.constant 2 : i32
    %64 = arith.muli %arg0, %c2_i32_40 : i32
    %c0_i32_41 = arith.constant 0 : i32
    %65 = arith.addi %64, %c0_i32_41 : i32
    %66 = arith.index_cast %65 : i32 to index
    %c8 = arith.constant 8 : index
    %67 = memref.load %arg1[%66, %c8] : memref<2x16xi32, #tpu.memory_space<smem>>
    %c0_i32_42 = arith.constant 0 : i32
    %c0_i32_43 = arith.constant 0 : i32
    %68 = tpu.memref_slice %arg2[%67, %c0_i32_43] : memref<50x32xf32, #tpu.memory_space<any>> -> memref<1x32xf32, #tpu.memory_space<any>>
    %c8_i32 = arith.constant 8 : i32
    %c0_i32_44 = arith.constant 0 : i32
    %69 = tpu.memref_slice %arg8[%c8_i32, %c0_i32_44] : memref<32x32xf32, #tpu.memory_space<vmem>> -> memref<1x32xf32, #tpu.memory_space<vmem>>
    %70 = tpu.memref_slice %arg9[%c0_i32_42] : memref<1x!tpu.dma_semaphore, #tpu.memory_space<semaphore_mem>> -> memref<1x!tpu.dma_semaphore, #tpu.memory_space<semaphore_mem>>
    %71 = tpu.memref_squeeze %70 : memref<1x!tpu.dma_semaphore, #tpu.memory_space<semaphore_mem>> -> memref<!tpu.dma_semaphore, #tpu.memory_space<semaphore_mem>>
    tpu.enqueue_dma source(%68 : memref<1x32xf32, #tpu.memory_space<any>>) target(%69 : memref<1x32xf32, #tpu.memory_space<vmem>>) target_semaphore(%71 : memref<!tpu.dma_semaphore, #tpu.memory_space<semaphore_mem>>)
    %c2_i32_45 = arith.constant 2 : i32
    %72 = arith.muli %arg0, %c2_i32_45 : i32
    %c0_i32_46 = arith.constant 0 : i32
    %73 = arith.addi %72, %c0_i32_46 : i32
    %74 = arith.index_cast %73 : i32 to index
    %c9 = arith.constant 9 : index
    %75 = memref.load %arg1[%74, %c9] : memref<2x16xi32, #tpu.memory_space<smem>>
    %c0_i32_47 = arith.constant 0 : i32
    %c0_i32_48 = arith.constant 0 : i32
    %76 = tpu.memref_slice %arg2[%75, %c0_i32_48] : memref<50x32xf32, #tpu.memory_space<any>> -> memref<1x32xf32, #tpu.memory_space<any>>
    %c9_i32 = arith.constant 9 : i32
    %c0_i32_49 = arith.constant 0 : i32
    %77 = tpu.memref_slice %arg8[%c9_i32, %c0_i32_49] : memref<32x32xf32, #tpu.memory_space<vmem>> -> memref<1x32xf32, #tpu.memory_space<vmem>>
    %78 = tpu.memref_slice %arg9[%c0_i32_47] : memref<1x!tpu.dma_semaphore, #tpu.memory_space<semaphore_mem>> -> memref<1x!tpu.dma_semaphore, #tpu.memory_space<semaphore_mem>>
    %79 = tpu.memref_squeeze %78 : memref<1x!tpu.dma_semaphore, #tpu.memory_space<semaphore_mem>> -> memref<!tpu.dma_semaphore, #tpu.memory_space<semaphore_mem>>
    tpu.enqueue_dma source(%76 : memref<1x32xf32, #tpu.memory_space<any>>) target(%77 : memref<1x32xf32, #tpu.memory_space<vmem>>) target_semaphore(%79 : memref<!tpu.dma_semaphore, #tpu.memory_space<semaphore_mem>>)
    %c2_i32_50 = arith.constant 2 : i32
    %80 = arith.muli %arg0, %c2_i32_50 : i32
    %c0_i32_51 = arith.constant 0 : i32
    %81 = arith.addi %80, %c0_i32_51 : i32
    %82 = arith.index_cast %81 : i32 to index
    %c10 = arith.constant 10 : index
    %83 = memref.load %arg1[%82, %c10] : memref<2x16xi32, #tpu.memory_space<smem>>
    %c0_i32_52 = arith.constant 0 : i32
    %c0_i32_53 = arith.constant 0 : i32
    %84 = tpu.memref_slice %arg2[%83, %c0_i32_53] : memref<50x32xf32, #tpu.memory_space<any>> -> memref<1x32xf32, #tpu.memory_space<any>>
    %c10_i32 = arith.constant 10 : i32
    %c0_i32_54 = arith.constant 0 : i32
    %85 = tpu.memref_slice %arg8[%c10_i32, %c0_i32_54] : memref<32x32xf32, #tpu.memory_space<vmem>> -> memref<1x32xf32, #tpu.memory_space<vmem>>
    %86 = tpu.memref_slice %arg9[%c0_i32_52] : memref<1x!tpu.dma_semaphore, #tpu.memory_space<semaphore_mem>> -> memref<1x!tpu.dma_semaphore, #tpu.memory_space<semaphore_mem>>
    %87 = tpu.memref_squeeze %86 : memref<1x!tpu.dma_semaphore, #tpu.memory_space<semaphore_mem>> -> memref<!tpu.dma_semaphore, #tpu.memory_space<semaphore_mem>>
    tpu.enqueue_dma source(%84 : memref<1x32xf32, #tpu.memory_space<any>>) target(%85 : memref<1x32xf32, #tpu.memory_space<vmem>>) target_semaphore(%87 : memref<!tpu.dma_semaphore, #tpu.memory_space<semaphore_mem>>)
    %c2_i32_55 = arith.constant 2 : i32
    %88 = arith.muli %arg0, %c2_i32_55 : i32
    %c0_i32_56 = arith.constant 0 : i32
    %89 = arith.addi %88, %c0_i32_56 : i32
    %90 = arith.index_cast %89 : i32 to index
    %c11 = arith.constant 11 : index
    %91 = memref.load %arg1[%90, %c11] : memref<2x16xi32, #tpu.memory_space<smem>>
    %c0_i32_57 = arith.constant 0 : i32
    %c0_i32_58 = arith.constant 0 : i32
    %92 = tpu.memref_slice %arg2[%91, %c0_i32_58] : memref<50x32xf32, #tpu.memory_space<any>> -> memref<1x32xf32, #tpu.memory_space<any>>
    %c11_i32 = arith.constant 11 : i32
    %c0_i32_59 = arith.constant 0 : i32
    %93 = tpu.memref_slice %arg8[%c11_i32, %c0_i32_59] : memref<32x32xf32, #tpu.memory_space<vmem>> -> memref<1x32xf32, #tpu.memory_space<vmem>>
    %94 = tpu.memref_slice %arg9[%c0_i32_57] : memref<1x!tpu.dma_semaphore, #tpu.memory_space<semaphore_mem>> -> memref<1x!tpu.dma_semaphore, #tpu.memory_space<semaphore_mem>>
    %95 = tpu.memref_squeeze %94 : memref<1x!tpu.dma_semaphore, #tpu.memory_space<semaphore_mem>> -> memref<!tpu.dma_semaphore, #tpu.memory_space<semaphore_mem>>
    tpu.enqueue_dma source(%92 : memref<1x32xf32, #tpu.memory_space<any>>) target(%93 : memref<1x32xf32, #tpu.memory_space<vmem>>) target_semaphore(%95 : memref<!tpu.dma_semaphore, #tpu.memory_space<semaphore_mem>>)
    %c2_i32_60 = arith.constant 2 : i32
    %96 = arith.muli %arg0, %c2_i32_60 : i32
    %c0_i32_61 = arith.constant 0 : i32
    %97 = arith.addi %96, %c0_i32_61 : i32
    %98 = arith.index_cast %97 : i32 to index
    %c12 = arith.constant 12 : index
    %99 = memref.load %arg1[%98, %c12] : memref<2x16xi32, #tpu.memory_space<smem>>
    %c0_i32_62 = arith.constant 0 : i32
    %c0_i32_63 = arith.constant 0 : i32
    %100 = tpu.memref_slice %arg2[%99, %c0_i32_63] : memref<50x32xf32, #tpu.memory_space<any>> -> memref<1x32xf32, #tpu.memory_space<any>>
    %c12_i32 = arith.constant 12 : i32
    %c0_i32_64 = arith.constant 0 : i32
    %101 = tpu.memref_slice %arg8[%c12_i32, %c0_i32_64] : memref<32x32xf32, #tpu.memory_space<vmem>> -> memref<1x32xf32, #tpu.memory_space<vmem>>
    %102 = tpu.memref_slice %arg9[%c0_i32_62] : memref<1x!tpu.dma_semaphore, #tpu.memory_space<semaphore_mem>> -> memref<1x!tpu.dma_semaphore, #tpu.memory_space<semaphore_mem>>
    %103 = tpu.memref_squeeze %102 : memref<1x!tpu.dma_semaphore, #tpu.memory_space<semaphore_mem>> -> memref<!tpu.dma_semaphore, #tpu.memory_space<semaphore_mem>>
    tpu.enqueue_dma source(%100 : memref<1x32xf32, #tpu.memory_space<any>>) target(%101 : memref<1x32xf32, #tpu.memory_space<vmem>>) target_semaphore(%103 : memref<!tpu.dma_semaphore, #tpu.memory_space<semaphore_mem>>)
    %c2_i32_65 = arith.constant 2 : i32
    %104 = arith.muli %arg0, %c2_i32_65 : i32
    %c0_i32_66 = arith.constant 0 : i32
    %105 = arith.addi %104, %c0_i32_66 : i32
    %106 = arith.index_cast %105 : i32 to index
    %c13 = arith.constant 13 : index
    %107 = memref.load %arg1[%106, %c13] : memref<2x16xi32, #tpu.memory_space<smem>>
    %c0_i32_67 = arith.constant 0 : i32
    %c0_i32_68 = arith.constant 0 : i32
    %108 = tpu.memref_slice %arg2[%107, %c0_i32_68] : memref<50x32xf32, #tpu.memory_space<any>> -> memref<1x32xf32, #tpu.memory_space<any>>
    %c13_i32 = arith.constant 13 : i32
    %c0_i32_69 = arith.constant 0 : i32
    %109 = tpu.memref_slice %arg8[%c13_i32, %c0_i32_69] : memref<32x32xf32, #tpu.memory_space<vmem>> -> memref<1x32xf32, #tpu.memory_space<vmem>>
    %110 = tpu.memref_slice %arg9[%c0_i32_67] : memref<1x!tpu.dma_semaphore, #tpu.memory_space<semaphore_mem>> -> memref<1x!tpu.dma_semaphore, #tpu.memory_space<semaphore_mem>>
    %111 = tpu.memref_squeeze %110 : memref<1x!tpu.dma_semaphore, #tpu.memory_space<semaphore_mem>> -> memref<!tpu.dma_semaphore, #tpu.memory_space<semaphore_mem>>
    tpu.enqueue_dma source(%108 : memref<1x32xf32, #tpu.memory_space<any>>) target(%109 : memref<1x32xf32, #tpu.memory_space<vmem>>) target_semaphore(%111 : memref<!tpu.dma_semaphore, #tpu.memory_space<semaphore_mem>>)
    %c2_i32_70 = arith.constant 2 : i32
    %112 = arith.muli %arg0, %c2_i32_70 : i32
    %c0_i32_71 = arith.constant 0 : i32
    %113 = arith.addi %112, %c0_i32_71 : i32
    %114 = arith.index_cast %113 : i32 to index
    %c14 = arith.constant 14 : index
    %115 = memref.load %arg1[%114, %c14] : memref<2x16xi32, #tpu.memory_space<smem>>
    %c0_i32_72 = arith.constant 0 : i32
    %c0_i32_73 = arith.constant 0 : i32
    %116 = tpu.memref_slice %arg2[%115, %c0_i32_73] : memref<50x32xf32, #tpu.memory_space<any>> -> memref<1x32xf32, #tpu.memory_space<any>>
    %c14_i32 = arith.constant 14 : i32
    %c0_i32_74 = arith.constant 0 : i32
    %117 = tpu.memref_slice %arg8[%c14_i32, %c0_i32_74] : memref<32x32xf32, #tpu.memory_space<vmem>> -> memref<1x32xf32, #tpu.memory_space<vmem>>
    %118 = tpu.memref_slice %arg9[%c0_i32_72] : memref<1x!tpu.dma_semaphore, #tpu.memory_space<semaphore_mem>> -> memref<1x!tpu.dma_semaphore, #tpu.memory_space<semaphore_mem>>
    %119 = tpu.memref_squeeze %118 : memref<1x!tpu.dma_semaphore, #tpu.memory_space<semaphore_mem>> -> memref<!tpu.dma_semaphore, #tpu.memory_space<semaphore_mem>>
    tpu.enqueue_dma source(%116 : memref<1x32xf32, #tpu.memory_space<any>>) target(%117 : memref<1x32xf32, #tpu.memory_space<vmem>>) target_semaphore(%119 : memref<!tpu.dma_semaphore, #tpu.memory_space<semaphore_mem>>)
    %c2_i32_75 = arith.constant 2 : i32
    %120 = arith.muli %arg0, %c2_i32_75 : i32
    %c0_i32_76 = arith.constant 0 : i32
    %121 = arith.addi %120, %c0_i32_76 : i32
    %122 = arith.index_cast %121 : i32 to index
    %c15 = arith.constant 15 : index
    %123 = memref.load %arg1[%122, %c15] : memref<2x16xi32, #tpu.memory_space<smem>>
    %c0_i32_77 = arith.constant 0 : i32
    %c0_i32_78 = arith.constant 0 : i32
    %124 = tpu.memref_slice %arg2[%123, %c0_i32_78] : memref<50x32xf32, #tpu.memory_space<any>> -> memref<1x32xf32, #tpu.memory_space<any>>
    %c15_i32 = arith.constant 15 : i32
    %c0_i32_79 = arith.constant 0 : i32
    %125 = tpu.memref_slice %arg8[%c15_i32, %c0_i32_79] : memref<32x32xf32, #tpu.memory_space<vmem>> -> memref<1x32xf32, #tpu.memory_space<vmem>>
    %126 = tpu.memref_slice %arg9[%c0_i32_77] : memref<1x!tpu.dma_semaphore, #tpu.memory_space<semaphore_mem>> -> memref<1x!tpu.dma_semaphore, #tpu.memory_space<semaphore_mem>>
    %127 = tpu.memref_squeeze %126 : memref<1x!tpu.dma_semaphore, #tpu.memory_space<semaphore_mem>> -> memref<!tpu.dma_semaphore, #tpu.memory_space<semaphore_mem>>
    tpu.enqueue_dma source(%124 : memref<1x32xf32, #tpu.memory_space<any>>) target(%125 : memref<1x32xf32, #tpu.memory_space<vmem>>) target_semaphore(%127 : memref<!tpu.dma_semaphore, #tpu.memory_space<semaphore_mem>>)
    %c2_i32_80 = arith.constant 2 : i32
    %128 = arith.muli %arg0, %c2_i32_80 : i32
    %c1_i32_81 = arith.constant 1 : i32
    %129 = arith.addi %128, %c1_i32_81 : i32
    %130 = arith.index_cast %129 : i32 to index
    %c0_82 = arith.constant 0 : index
    %131 = memref.load %arg1[%130, %c0_82] : memref<2x16xi32, #tpu.memory_space<smem>>
    %c0_i32_83 = arith.constant 0 : i32
    %c0_i32_84 = arith.constant 0 : i32
    %132 = tpu.memref_slice %arg2[%131, %c0_i32_84] : memref<50x32xf32, #tpu.memory_space<any>> -> memref<1x32xf32, #tpu.memory_space<any>>
    %c16_i32 = arith.constant 16 : i32
    %c0_i32_85 = arith.constant 0 : i32
    %133 = tpu.memref_slice %arg8[%c16_i32, %c0_i32_85] : memref<32x32xf32, #tpu.memory_space<vmem>> -> memref<1x32xf32, #tpu.memory_space<vmem>>
    %134 = tpu.memref_slice %arg9[%c0_i32_83] : memref<1x!tpu.dma_semaphore, #tpu.memory_space<semaphore_mem>> -> memref<1x!tpu.dma_semaphore, #tpu.memory_space<semaphore_mem>>
    %135 = tpu.memref_squeeze %134 : memref<1x!tpu.dma_semaphore, #tpu.memory_space<semaphore_mem>> -> memref<!tpu.dma_semaphore, #tpu.memory_space<semaphore_mem>>
    tpu.enqueue_dma source(%132 : memref<1x32xf32, #tpu.memory_space<any>>) target(%133 : memref<1x32xf32, #tpu.memory_space<vmem>>) target_semaphore(%135 : memref<!tpu.dma_semaphore, #tpu.memory_space<semaphore_mem>>)
    %c2_i32_86 = arith.constant 2 : i32
    %136 = arith.muli %arg0, %c2_i32_86 : i32
    %c1_i32_87 = arith.constant 1 : i32
    %137 = arith.addi %136, %c1_i32_87 : i32
    %138 = arith.index_cast %137 : i32 to index
    %c1_88 = arith.constant 1 : index
    %139 = memref.load %arg1[%138, %c1_88] : memref<2x16xi32, #tpu.memory_space<smem>>
    %c0_i32_89 = arith.constant 0 : i32
    %c0_i32_90 = arith.constant 0 : i32
    %140 = tpu.memref_slice %arg2[%139, %c0_i32_90] : memref<50x32xf32, #tpu.memory_space<any>> -> memref<1x32xf32, #tpu.memory_space<any>>
    %c17_i32 = arith.constant 17 : i32
    %c0_i32_91 = arith.constant 0 : i32
    %141 = tpu.memref_slice %arg8[%c17_i32, %c0_i32_91] : memref<32x32xf32, #tpu.memory_space<vmem>> -> memref<1x32xf32, #tpu.memory_space<vmem>>
    %142 = tpu.memref_slice %arg9[%c0_i32_89] : memref<1x!tpu.dma_semaphore, #tpu.memory_space<semaphore_mem>> -> memref<1x!tpu.dma_semaphore, #tpu.memory_space<semaphore_mem>>
    %143 = tpu.memref_squeeze %142 : memref<1x!tpu.dma_semaphore, #tpu.memory_space<semaphore_mem>> -> memref<!tpu.dma_semaphore, #tpu.memory_space<semaphore_mem>>
    tpu.enqueue_dma source(%140 : memref<1x32xf32, #tpu.memory_space<any>>) target(%141 : memref<1x32xf32, #tpu.memory_space<vmem>>) target_semaphore(%143 : memref<!tpu.dma_semaphore, #tpu.memory_space<semaphore_mem>>)
    %c2_i32_92 = arith.constant 2 : i32
    %144 = arith.muli %arg0, %c2_i32_92 : i32
    %c1_i32_93 = arith.constant 1 : i32
    %145 = arith.addi %144, %c1_i32_93 : i32
    %146 = arith.index_cast %145 : i32 to index
    %c2_94 = arith.constant 2 : index
    %147 = memref.load %arg1[%146, %c2_94] : memref<2x16xi32, #tpu.memory_space<smem>>
    %c0_i32_95 = arith.constant 0 : i32
    %c0_i32_96 = arith.constant 0 : i32
    %148 = tpu.memref_slice %arg2[%147, %c0_i32_96] : memref<50x32xf32, #tpu.memory_space<any>> -> memref<1x32xf32, #tpu.memory_space<any>>
    %c18_i32 = arith.constant 18 : i32
    %c0_i32_97 = arith.constant 0 : i32
    %149 = tpu.memref_slice %arg8[%c18_i32, %c0_i32_97] : memref<32x32xf32, #tpu.memory_space<vmem>> -> memref<1x32xf32, #tpu.memory_space<vmem>>
    %150 = tpu.memref_slice %arg9[%c0_i32_95] : memref<1x!tpu.dma_semaphore, #tpu.memory_space<semaphore_mem>> -> memref<1x!tpu.dma_semaphore, #tpu.memory_space<semaphore_mem>>
    %151 = tpu.memref_squeeze %150 : memref<1x!tpu.dma_semaphore, #tpu.memory_space<semaphore_mem>> -> memref<!tpu.dma_semaphore, #tpu.memory_space<semaphore_mem>>
    tpu.enqueue_dma source(%148 : memref<1x32xf32, #tpu.memory_space<any>>) target(%149 : memref<1x32xf32, #tpu.memory_space<vmem>>) target_semaphore(%151 : memref<!tpu.dma_semaphore, #tpu.memory_space<semaphore_mem>>)
    %c2_i32_98 = arith.constant 2 : i32
    %152 = arith.muli %arg0, %c2_i32_98 : i32
    %c1_i32_99 = arith.constant 1 : i32
    %153 = arith.addi %152, %c1_i32_99 : i32
    %154 = arith.index_cast %153 : i32 to index
    %c3_100 = arith.constant 3 : index
    %155 = memref.load %arg1[%154, %c3_100] : memref<2x16xi32, #tpu.memory_space<smem>>
    %c0_i32_101 = arith.constant 0 : i32
    %c0_i32_102 = arith.constant 0 : i32
    %156 = tpu.memref_slice %arg2[%155, %c0_i32_102] : memref<50x32xf32, #tpu.memory_space<any>> -> memref<1x32xf32, #tpu.memory_space<any>>
    %c19_i32 = arith.constant 19 : i32
    %c0_i32_103 = arith.constant 0 : i32
    %157 = tpu.memref_slice %arg8[%c19_i32, %c0_i32_103] : memref<32x32xf32, #tpu.memory_space<vmem>> -> memref<1x32xf32, #tpu.memory_space<vmem>>
    %158 = tpu.memref_slice %arg9[%c0_i32_101] : memref<1x!tpu.dma_semaphore, #tpu.memory_space<semaphore_mem>> -> memref<1x!tpu.dma_semaphore, #tpu.memory_space<semaphore_mem>>
    %159 = tpu.memref_squeeze %158 : memref<1x!tpu.dma_semaphore, #tpu.memory_space<semaphore_mem>> -> memref<!tpu.dma_semaphore, #tpu.memory_space<semaphore_mem>>
    tpu.enqueue_dma source(%156 : memref<1x32xf32, #tpu.memory_space<any>>) target(%157 : memref<1x32xf32, #tpu.memory_space<vmem>>) target_semaphore(%159 : memref<!tpu.dma_semaphore, #tpu.memory_space<semaphore_mem>>)
    %c2_i32_104 = arith.constant 2 : i32
    %160 = arith.muli %arg0, %c2_i32_104 : i32
    %c1_i32_105 = arith.constant 1 : i32
    %161 = arith.addi %160, %c1_i32_105 : i32
    %162 = arith.index_cast %161 : i32 to index
    %c4_106 = arith.constant 4 : index
    %163 = memref.load %arg1[%162, %c4_106] : memref<2x16xi32, #tpu.memory_space<smem>>
    %c0_i32_107 = arith.constant 0 : i32
    %c0_i32_108 = arith.constant 0 : i32
    %164 = tpu.memref_slice %arg2[%163, %c0_i32_108] : memref<50x32xf32, #tpu.memory_space<any>> -> memref<1x32xf32, #tpu.memory_space<any>>
    %c20_i32 = arith.constant 20 : i32
    %c0_i32_109 = arith.constant 0 : i32
    %165 = tpu.memref_slice %arg8[%c20_i32, %c0_i32_109] : memref<32x32xf32, #tpu.memory_space<vmem>> -> memref<1x32xf32, #tpu.memory_space<vmem>>
    %166 = tpu.memref_slice %arg9[%c0_i32_107] : memref<1x!tpu.dma_semaphore, #tpu.memory_space<semaphore_mem>> -> memref<1x!tpu.dma_semaphore, #tpu.memory_space<semaphore_mem>>
    %167 = tpu.memref_squeeze %166 : memref<1x!tpu.dma_semaphore, #tpu.memory_space<semaphore_mem>> -> memref<!tpu.dma_semaphore, #tpu.memory_space<semaphore_mem>>
    tpu.enqueue_dma source(%164 : memref<1x32xf32, #tpu.memory_space<any>>) target(%165 : memref<1x32xf32, #tpu.memory_space<vmem>>) target_semaphore(%167 : memref<!tpu.dma_semaphore, #tpu.memory_space<semaphore_mem>>)
    %c2_i32_110 = arith.constant 2 : i32
    %168 = arith.muli %arg0, %c2_i32_110 : i32
    %c1_i32_111 = arith.constant 1 : i32
    %169 = arith.addi %168, %c1_i32_111 : i32
    %170 = arith.index_cast %169 : i32 to index
    %c5_112 = arith.constant 5 : index
    %171 = memref.load %arg1[%170, %c5_112] : memref<2x16xi32, #tpu.memory_space<smem>>
    %c0_i32_113 = arith.constant 0 : i32
    %c0_i32_114 = arith.constant 0 : i32
    %172 = tpu.memref_slice %arg2[%171, %c0_i32_114] : memref<50x32xf32, #tpu.memory_space<any>> -> memref<1x32xf32, #tpu.memory_space<any>>
    %c21_i32 = arith.constant 21 : i32
    %c0_i32_115 = arith.constant 0 : i32
    %173 = tpu.memref_slice %arg8[%c21_i32, %c0_i32_115] : memref<32x32xf32, #tpu.memory_space<vmem>> -> memref<1x32xf32, #tpu.memory_space<vmem>>
    %174 = tpu.memref_slice %arg9[%c0_i32_113] : memref<1x!tpu.dma_semaphore, #tpu.memory_space<semaphore_mem>> -> memref<1x!tpu.dma_semaphore, #tpu.memory_space<semaphore_mem>>
    %175 = tpu.memref_squeeze %174 : memref<1x!tpu.dma_semaphore, #tpu.memory_space<semaphore_mem>> -> memref<!tpu.dma_semaphore, #tpu.memory_space<semaphore_mem>>
    tpu.enqueue_dma source(%172 : memref<1x32xf32, #tpu.memory_space<any>>) target(%173 : memref<1x32xf32, #tpu.memory_space<vmem>>) target_semaphore(%175 : memref<!tpu.dma_semaphore, #tpu.memory_space<semaphore_mem>>)
    %c2_i32_116 = arith.constant 2 : i32
    %176 = arith.muli %arg0, %c2_i32_116 : i32
    %c1_i32_117 = arith.constant 1 : i32
    %177 = arith.addi %176, %c1_i32_117 : i32
    %178 = arith.index_cast %177 : i32 to index
    %c6_118 = arith.constant 6 : index
    %179 = memref.load %arg1[%178, %c6_118] : memref<2x16xi32, #tpu.memory_space<smem>>
    %c0_i32_119 = arith.constant 0 : i32
    %c0_i32_120 = arith.constant 0 : i32
    %180 = tpu.memref_slice %arg2[%179, %c0_i32_120] : memref<50x32xf32, #tpu.memory_space<any>> -> memref<1x32xf32, #tpu.memory_space<any>>
    %c22_i32 = arith.constant 22 : i32
    %c0_i32_121 = arith.constant 0 : i32
    %181 = tpu.memref_slice %arg8[%c22_i32, %c0_i32_121] : memref<32x32xf32, #tpu.memory_space<vmem>> -> memref<1x32xf32, #tpu.memory_space<vmem>>
    %182 = tpu.memref_slice %arg9[%c0_i32_119] : memref<1x!tpu.dma_semaphore, #tpu.memory_space<semaphore_mem>> -> memref<1x!tpu.dma_semaphore, #tpu.memory_space<semaphore_mem>>
    %183 = tpu.memref_squeeze %182 : memref<1x!tpu.dma_semaphore, #tpu.memory_space<semaphore_mem>> -> memref<!tpu.dma_semaphore, #tpu.memory_space<semaphore_mem>>
    tpu.enqueue_dma source(%180 : memref<1x32xf32, #tpu.memory_space<any>>) target(%181 : memref<1x32xf32, #tpu.memory_space<vmem>>) target_semaphore(%183 : memref<!tpu.dma_semaphore, #tpu.memory_space<semaphore_mem>>)
    %c2_i32_122 = arith.constant 2 : i32
    %184 = arith.muli %arg0, %c2_i32_122 : i32
    %c1_i32_123 = arith.constant 1 : i32
    %185 = arith.addi %184, %c1_i32_123 : i32
    %186 = arith.index_cast %185 : i32 to index
    %c7_124 = arith.constant 7 : index
    %187 = memref.load %arg1[%186, %c7_124] : memref<2x16xi32, #tpu.memory_space<smem>>
    %c0_i32_125 = arith.constant 0 : i32
    %c0_i32_126 = arith.constant 0 : i32
    %188 = tpu.memref_slice %arg2[%187, %c0_i32_126] : memref<50x32xf32, #tpu.memory_space<any>> -> memref<1x32xf32, #tpu.memory_space<any>>
    %c23_i32 = arith.constant 23 : i32
    %c0_i32_127 = arith.constant 0 : i32
    %189 = tpu.memref_slice %arg8[%c23_i32, %c0_i32_127] : memref<32x32xf32, #tpu.memory_space<vmem>> -> memref<1x32xf32, #tpu.memory_space<vmem>>
    %190 = tpu.memref_slice %arg9[%c0_i32_125] : memref<1x!tpu.dma_semaphore, #tpu.memory_space<semaphore_mem>> -> memref<1x!tpu.dma_semaphore, #tpu.memory_space<semaphore_mem>>
    %191 = tpu.memref_squeeze %190 : memref<1x!tpu.dma_semaphore, #tpu.memory_space<semaphore_mem>> -> memref<!tpu.dma_semaphore, #tpu.memory_space<semaphore_mem>>
    tpu.enqueue_dma source(%188 : memref<1x32xf32, #tpu.memory_space<any>>) target(%189 : memref<1x32xf32, #tpu.memory_space<vmem>>) target_semaphore(%191 : memref<!tpu.dma_semaphore, #tpu.memory_space<semaphore_mem>>)
    %c2_i32_128 = arith.constant 2 : i32
    %192 = arith.muli %arg0, %c2_i32_128 : i32
    %c1_i32_129 = arith.constant 1 : i32
    %193 = arith.addi %192, %c1_i32_129 : i32
    %194 = arith.index_cast %193 : i32 to index
    %c8_130 = arith.constant 8 : index
    %195 = memref.load %arg1[%194, %c8_130] : memref<2x16xi32, #tpu.memory_space<smem>>
    %c0_i32_131 = arith.constant 0 : i32
    %c0_i32_132 = arith.constant 0 : i32
    %196 = tpu.memref_slice %arg2[%195, %c0_i32_132] : memref<50x32xf32, #tpu.memory_space<any>> -> memref<1x32xf32, #tpu.memory_space<any>>
    %c24_i32 = arith.constant 24 : i32
    %c0_i32_133 = arith.constant 0 : i32
    %197 = tpu.memref_slice %arg8[%c24_i32, %c0_i32_133] : memref<32x32xf32, #tpu.memory_space<vmem>> -> memref<1x32xf32, #tpu.memory_space<vmem>>
    %198 = tpu.memref_slice %arg9[%c0_i32_131] : memref<1x!tpu.dma_semaphore, #tpu.memory_space<semaphore_mem>> -> memref<1x!tpu.dma_semaphore, #tpu.memory_space<semaphore_mem>>
    %199 = tpu.memref_squeeze %198 : memref<1x!tpu.dma_semaphore, #tpu.memory_space<semaphore_mem>> -> memref<!tpu.dma_semaphore, #tpu.memory_space<semaphore_mem>>
    tpu.enqueue_dma source(%196 : memref<1x32xf32, #tpu.memory_space<any>>) target(%197 : memref<1x32xf32, #tpu.memory_space<vmem>>) target_semaphore(%199 : memref<!tpu.dma_semaphore, #tpu.memory_space<semaphore_mem>>)
    %c2_i32_134 = arith.constant 2 : i32
    %200 = arith.muli %arg0, %c2_i32_134 : i32
    %c1_i32_135 = arith.constant 1 : i32
    %201 = arith.addi %200, %c1_i32_135 : i32
    %202 = arith.index_cast %201 : i32 to index
    %c9_136 = arith.constant 9 : index
    %203 = memref.load %arg1[%202, %c9_136] : memref<2x16xi32, #tpu.memory_space<smem>>
    %c0_i32_137 = arith.constant 0 : i32
    %c0_i32_138 = arith.constant 0 : i32
    %204 = tpu.memref_slice %arg2[%203, %c0_i32_138] : memref<50x32xf32, #tpu.memory_space<any>> -> memref<1x32xf32, #tpu.memory_space<any>>
    %c25_i32 = arith.constant 25 : i32
    %c0_i32_139 = arith.constant 0 : i32
    %205 = tpu.memref_slice %arg8[%c25_i32, %c0_i32_139] : memref<32x32xf32, #tpu.memory_space<vmem>> -> memref<1x32xf32, #tpu.memory_space<vmem>>
    %206 = tpu.memref_slice %arg9[%c0_i32_137] : memref<1x!tpu.dma_semaphore, #tpu.memory_space<semaphore_mem>> -> memref<1x!tpu.dma_semaphore, #tpu.memory_space<semaphore_mem>>
    %207 = tpu.memref_squeeze %206 : memref<1x!tpu.dma_semaphore, #tpu.memory_space<semaphore_mem>> -> memref<!tpu.dma_semaphore, #tpu.memory_space<semaphore_mem>>
    tpu.enqueue_dma source(%204 : memref<1x32xf32, #tpu.memory_space<any>>) target(%205 : memref<1x32xf32, #tpu.memory_space<vmem>>) target_semaphore(%207 : memref<!tpu.dma_semaphore, #tpu.memory_space<semaphore_mem>>)
    %c2_i32_140 = arith.constant 2 : i32
    %208 = arith.muli %arg0, %c2_i32_140 : i32
    %c1_i32_141 = arith.constant 1 : i32
    %209 = arith.addi %208, %c1_i32_141 : i32
    %210 = arith.index_cast %209 : i32 to index
    %c10_142 = arith.constant 10 : index
    %211 = memref.load %arg1[%210, %c10_142] : memref<2x16xi32, #tpu.memory_space<smem>>
    %c0_i32_143 = arith.constant 0 : i32
    %c0_i32_144 = arith.constant 0 : i32
    %212 = tpu.memref_slice %arg2[%211, %c0_i32_144] : memref<50x32xf32, #tpu.memory_space<any>> -> memref<1x32xf32, #tpu.memory_space<any>>
    %c26_i32 = arith.constant 26 : i32
    %c0_i32_145 = arith.constant 0 : i32
    %213 = tpu.memref_slice %arg8[%c26_i32, %c0_i32_145] : memref<32x32xf32, #tpu.memory_space<vmem>> -> memref<1x32xf32, #tpu.memory_space<vmem>>
    %214 = tpu.memref_slice %arg9[%c0_i32_143] : memref<1x!tpu.dma_semaphore, #tpu.memory_space<semaphore_mem>> -> memref<1x!tpu.dma_semaphore, #tpu.memory_space<semaphore_mem>>
    %215 = tpu.memref_squeeze %214 : memref<1x!tpu.dma_semaphore, #tpu.memory_space<semaphore_mem>> -> memref<!tpu.dma_semaphore, #tpu.memory_space<semaphore_mem>>
    tpu.enqueue_dma source(%212 : memref<1x32xf32, #tpu.memory_space<any>>) target(%213 : memref<1x32xf32, #tpu.memory_space<vmem>>) target_semaphore(%215 : memref<!tpu.dma_semaphore, #tpu.memory_space<semaphore_mem>>)
    %c2_i32_146 = arith.constant 2 : i32
    %216 = arith.muli %arg0, %c2_i32_146 : i32
    %c1_i32_147 = arith.constant 1 : i32
    %217 = arith.addi %216, %c1_i32_147 : i32
    %218 = arith.index_cast %217 : i32 to index
    %c11_148 = arith.constant 11 : index
    %219 = memref.load %arg1[%218, %c11_148] : memref<2x16xi32, #tpu.memory_space<smem>>
    %c0_i32_149 = arith.constant 0 : i32
    %c0_i32_150 = arith.constant 0 : i32
    %220 = tpu.memref_slice %arg2[%219, %c0_i32_150] : memref<50x32xf32, #tpu.memory_space<any>> -> memref<1x32xf32, #tpu.memory_space<any>>
    %c27_i32 = arith.constant 27 : i32
    %c0_i32_151 = arith.constant 0 : i32
    %221 = tpu.memref_slice %arg8[%c27_i32, %c0_i32_151] : memref<32x32xf32, #tpu.memory_space<vmem>> -> memref<1x32xf32, #tpu.memory_space<vmem>>
    %222 = tpu.memref_slice %arg9[%c0_i32_149] : memref<1x!tpu.dma_semaphore, #tpu.memory_space<semaphore_mem>> -> memref<1x!tpu.dma_semaphore, #tpu.memory_space<semaphore_mem>>
    %223 = tpu.memref_squeeze %222 : memref<1x!tpu.dma_semaphore, #tpu.memory_space<semaphore_mem>> -> memref<!tpu.dma_semaphore, #tpu.memory_space<semaphore_mem>>
    tpu.enqueue_dma source(%220 : memref<1x32xf32, #tpu.memory_space<any>>) target(%221 : memref<1x32xf32, #tpu.memory_space<vmem>>) target_semaphore(%223 : memref<!tpu.dma_semaphore, #tpu.memory_space<semaphore_mem>>)
    %c2_i32_152 = arith.constant 2 : i32
    %224 = arith.muli %arg0, %c2_i32_152 : i32
    %c1_i32_153 = arith.constant 1 : i32
    %225 = arith.addi %224, %c1_i32_153 : i32
    %226 = arith.index_cast %225 : i32 to index
    %c12_154 = arith.constant 12 : index
    %227 = memref.load %arg1[%226, %c12_154] : memref<2x16xi32, #tpu.memory_space<smem>>
    %c0_i32_155 = arith.constant 0 : i32
    %c0_i32_156 = arith.constant 0 : i32
    %228 = tpu.memref_slice %arg2[%227, %c0_i32_156] : memref<50x32xf32, #tpu.memory_space<any>> -> memref<1x32xf32, #tpu.memory_space<any>>
    %c28_i32 = arith.constant 28 : i32
    %c0_i32_157 = arith.constant 0 : i32
    %229 = tpu.memref_slice %arg8[%c28_i32, %c0_i32_157] : memref<32x32xf32, #tpu.memory_space<vmem>> -> memref<1x32xf32, #tpu.memory_space<vmem>>
    %230 = tpu.memref_slice %arg9[%c0_i32_155] : memref<1x!tpu.dma_semaphore, #tpu.memory_space<semaphore_mem>> -> memref<1x!tpu.dma_semaphore, #tpu.memory_space<semaphore_mem>>
    %231 = tpu.memref_squeeze %230 : memref<1x!tpu.dma_semaphore, #tpu.memory_space<semaphore_mem>> -> memref<!tpu.dma_semaphore, #tpu.memory_space<semaphore_mem>>
    tpu.enqueue_dma source(%228 : memref<1x32xf32, #tpu.memory_space<any>>) target(%229 : memref<1x32xf32, #tpu.memory_space<vmem>>) target_semaphore(%231 : memref<!tpu.dma_semaphore, #tpu.memory_space<semaphore_mem>>)
    %c2_i32_158 = arith.constant 2 : i32
    %232 = arith.muli %arg0, %c2_i32_158 : i32
    %c1_i32_159 = arith.constant 1 : i32
    %233 = arith.addi %232, %c1_i32_159 : i32
    %234 = arith.index_cast %233 : i32 to index
    %c13_160 = arith.constant 13 : index
    %235 = memref.load %arg1[%234, %c13_160] : memref<2x16xi32, #tpu.memory_space<smem>>
    %c0_i32_161 = arith.constant 0 : i32
    %c0_i32_162 = arith.constant 0 : i32
    %236 = tpu.memref_slice %arg2[%235, %c0_i32_162] : memref<50x32xf32, #tpu.memory_space<any>> -> memref<1x32xf32, #tpu.memory_space<any>>
    %c29_i32 = arith.constant 29 : i32
    %c0_i32_163 = arith.constant 0 : i32
    %237 = tpu.memref_slice %arg8[%c29_i32, %c0_i32_163] : memref<32x32xf32, #tpu.memory_space<vmem>> -> memref<1x32xf32, #tpu.memory_space<vmem>>
    %238 = tpu.memref_slice %arg9[%c0_i32_161] : memref<1x!tpu.dma_semaphore, #tpu.memory_space<semaphore_mem>> -> memref<1x!tpu.dma_semaphore, #tpu.memory_space<semaphore_mem>>
    %239 = tpu.memref_squeeze %238 : memref<1x!tpu.dma_semaphore, #tpu.memory_space<semaphore_mem>> -> memref<!tpu.dma_semaphore, #tpu.memory_space<semaphore_mem>>
    tpu.enqueue_dma source(%236 : memref<1x32xf32, #tpu.memory_space<any>>) target(%237 : memref<1x32xf32, #tpu.memory_space<vmem>>) target_semaphore(%239 : memref<!tpu.dma_semaphore, #tpu.memory_space<semaphore_mem>>)
    %c2_i32_164 = arith.constant 2 : i32
    %240 = arith.muli %arg0, %c2_i32_164 : i32
    %c1_i32_165 = arith.constant 1 : i32
    %241 = arith.addi %240, %c1_i32_165 : i32
    %242 = arith.index_cast %241 : i32 to index
    %c14_166 = arith.constant 14 : index
    %243 = memref.load %arg1[%242, %c14_166] : memref<2x16xi32, #tpu.memory_space<smem>>
    %c0_i32_167 = arith.constant 0 : i32
    %c0_i32_168 = arith.constant 0 : i32
    %244 = tpu.memref_slice %arg2[%243, %c0_i32_168] : memref<50x32xf32, #tpu.memory_space<any>> -> memref<1x32xf32, #tpu.memory_space<any>>
    %c30_i32 = arith.constant 30 : i32
    %c0_i32_169 = arith.constant 0 : i32
    %245 = tpu.memref_slice %arg8[%c30_i32, %c0_i32_169] : memref<32x32xf32, #tpu.memory_space<vmem>> -> memref<1x32xf32, #tpu.memory_space<vmem>>
    %246 = tpu.memref_slice %arg9[%c0_i32_167] : memref<1x!tpu.dma_semaphore, #tpu.memory_space<semaphore_mem>> -> memref<1x!tpu.dma_semaphore, #tpu.memory_space<semaphore_mem>>
    %247 = tpu.memref_squeeze %246 : memref<1x!tpu.dma_semaphore, #tpu.memory_space<semaphore_mem>> -> memref<!tpu.dma_semaphore, #tpu.memory_space<semaphore_mem>>
    tpu.enqueue_dma source(%244 : memref<1x32xf32, #tpu.memory_space<any>>) target(%245 : memref<1x32xf32, #tpu.memory_space<vmem>>) target_semaphore(%247 : memref<!tpu.dma_semaphore, #tpu.memory_space<semaphore_mem>>)
    %c2_i32_170 = arith.constant 2 : i32
    %248 = arith.muli %arg0, %c2_i32_170 : i32
    %c1_i32_171 = arith.constant 1 : i32
    %249 = arith.addi %248, %c1_i32_171 : i32
    %250 = arith.index_cast %249 : i32 to index
    %c15_172 = arith.constant 15 : index
    %251 = memref.load %arg1[%250, %c15_172] : memref<2x16xi32, #tpu.memory_space<smem>>
    %c0_i32_173 = arith.constant 0 : i32
    %c0_i32_174 = arith.constant 0 : i32
    %252 = tpu.memref_slice %arg2[%251, %c0_i32_174] : memref<50x32xf32, #tpu.memory_space<any>> -> memref<1x32xf32, #tpu.memory_space<any>>
    %c31_i32 = arith.constant 31 : i32
    %c0_i32_175 = arith.constant 0 : i32
    %253 = tpu.memref_slice %arg8[%c31_i32, %c0_i32_175] : memref<32x32xf32, #tpu.memory_space<vmem>> -> memref<1x32xf32, #tpu.memory_space<vmem>>
    %254 = tpu.memref_slice %arg9[%c0_i32_173] : memref<1x!tpu.dma_semaphore, #tpu.memory_space<semaphore_mem>> -> memref<1x!tpu.dma_semaphore, #tpu.memory_space<semaphore_mem>>
    %255 = tpu.memref_squeeze %254 : memref<1x!tpu.dma_semaphore, #tpu.memory_space<semaphore_mem>> -> memref<!tpu.dma_semaphore, #tpu.memory_space<semaphore_mem>>
    tpu.enqueue_dma source(%252 : memref<1x32xf32, #tpu.memory_space<any>>) target(%253 : memref<1x32xf32, #tpu.memory_space<vmem>>) target_semaphore(%255 : memref<!tpu.dma_semaphore, #tpu.memory_space<semaphore_mem>>)
    %c0_i32_176 = arith.constant 0 : i32
    %c0_i32_177 = arith.constant 0 : i32
    %256 = tpu.memref_slice %arg2[%3, %c0_i32_177] : memref<50x32xf32, #tpu.memory_space<any>> -> memref<1x32xf32, #tpu.memory_space<any>>
    %c0_i32_178 = arith.constant 0 : i32
    %c0_i32_179 = arith.constant 0 : i32
    %257 = tpu.memref_slice %arg8[%c0_i32_178, %c0_i32_179] : memref<32x32xf32, #tpu.memory_space<vmem>> -> memref<1x32xf32, #tpu.memory_space<vmem>>
    %258 = tpu.memref_slice %arg9[%c0_i32_176] : memref<1x!tpu.dma_semaphore, #tpu.memory_space<semaphore_mem>> -> memref<1x!tpu.dma_semaphore, #tpu.memory_space<semaphore_mem>>
    %259 = tpu.memref_squeeze %258 : memref<1x!tpu.dma_semaphore, #tpu.memory_space<semaphore_mem>> -> memref<!tpu.dma_semaphore, #tpu.memory_space<semaphore_mem>>
    tpu.wait_dma2 semaphore(%259 : memref<!tpu.dma_semaphore, #tpu.memory_space<semaphore_mem>>) src(%256 : memref<1x32xf32, #tpu.memory_space<any>>) dst(%257 : memref<1x32xf32, #tpu.memory_space<vmem>>)
    %c0_i32_180 = arith.constant 0 : i32
    %c0_i32_181 = arith.constant 0 : i32
    %260 = tpu.memref_slice %arg2[%11, %c0_i32_181] : memref<50x32xf32, #tpu.memory_space<any>> -> memref<1x32xf32, #tpu.memory_space<any>>
    %c1_i32_182 = arith.constant 1 : i32
    %c0_i32_183 = arith.constant 0 : i32
    %261 = tpu.memref_slice %arg8[%c1_i32_182, %c0_i32_183] : memref<32x32xf32, #tpu.memory_space<vmem>> -> memref<1x32xf32, #tpu.memory_space<vmem>>
    %262 = tpu.memref_slice %arg9[%c0_i32_180] : memref<1x!tpu.dma_semaphore, #tpu.memory_space<semaphore_mem>> -> memref<1x!tpu.dma_semaphore, #tpu.memory_space<semaphore_mem>>
    %263 = tpu.memref_squeeze %262 : memref<1x!tpu.dma_semaphore, #tpu.memory_space<semaphore_mem>> -> memref<!tpu.dma_semaphore, #tpu.memory_space<semaphore_mem>>
    tpu.wait_dma2 semaphore(%263 : memref<!tpu.dma_semaphore, #tpu.memory_space<semaphore_mem>>) src(%260 : memref<1x32xf32, #tpu.memory_space<any>>) dst(%261 : memref<1x32xf32, #tpu.memory_space<vmem>>)
    %c0_i32_184 = arith.constant 0 : i32
    %c0_i32_185 = arith.constant 0 : i32
    %264 = tpu.memref_slice %arg2[%19, %c0_i32_185] : memref<50x32xf32, #tpu.memory_space<any>> -> memref<1x32xf32, #tpu.memory_space<any>>
    %c2_i32_186 = arith.constant 2 : i32
    %c0_i32_187 = arith.constant 0 : i32
    %265 = tpu.memref_slice %arg8[%c2_i32_186, %c0_i32_187] : memref<32x32xf32, #tpu.memory_space<vmem>> -> memref<1x32xf32, #tpu.memory_space<vmem>>
    %266 = tpu.memref_slice %arg9[%c0_i32_184] : memref<1x!tpu.dma_semaphore, #tpu.memory_space<semaphore_mem>> -> memref<1x!tpu.dma_semaphore, #tpu.memory_space<semaphore_mem>>
    %267 = tpu.memref_squeeze %266 : memref<1x!tpu.dma_semaphore, #tpu.memory_space<semaphore_mem>> -> memref<!tpu.dma_semaphore, #tpu.memory_space<semaphore_mem>>
    tpu.wait_dma2 semaphore(%267 : memref<!tpu.dma_semaphore, #tpu.memory_space<semaphore_mem>>) src(%264 : memref<1x32xf32, #tpu.memory_space<any>>) dst(%265 : memref<1x32xf32, #tpu.memory_space<vmem>>)
    %c0_i32_188 = arith.constant 0 : i32
    %c0_i32_189 = arith.constant 0 : i32
    %268 = tpu.memref_slice %arg2[%27, %c0_i32_189] : memref<50x32xf32, #tpu.memory_space<any>> -> memref<1x32xf32, #tpu.memory_space<any>>
    %c3_i32_190 = arith.constant 3 : i32
    %c0_i32_191 = arith.constant 0 : i32
    %269 = tpu.memref_slice %arg8[%c3_i32_190, %c0_i32_191] : memref<32x32xf32, #tpu.memory_space<vmem>> -> memref<1x32xf32, #tpu.memory_space<vmem>>
    %270 = tpu.memref_slice %arg9[%c0_i32_188] : memref<1x!tpu.dma_semaphore, #tpu.memory_space<semaphore_mem>> -> memref<1x!tpu.dma_semaphore, #tpu.memory_space<semaphore_mem>>
    %271 = tpu.memref_squeeze %270 : memref<1x!tpu.dma_semaphore, #tpu.memory_space<semaphore_mem>> -> memref<!tpu.dma_semaphore, #tpu.memory_space<semaphore_mem>>
    tpu.wait_dma2 semaphore(%271 : memref<!tpu.dma_semaphore, #tpu.memory_space<semaphore_mem>>) src(%268 : memref<1x32xf32, #tpu.memory_space<any>>) dst(%269 : memref<1x32xf32, #tpu.memory_space<vmem>>)
    %c0_i32_192 = arith.constant 0 : i32
    %c0_i32_193 = arith.constant 0 : i32
    %272 = tpu.memref_slice %arg2[%35, %c0_i32_193] : memref<50x32xf32, #tpu.memory_space<any>> -> memref<1x32xf32, #tpu.memory_space<any>>
    %c4_i32_194 = arith.constant 4 : i32
    %c0_i32_195 = arith.constant 0 : i32
    %273 = tpu.memref_slice %arg8[%c4_i32_194, %c0_i32_195] : memref<32x32xf32, #tpu.memory_space<vmem>> -> memref<1x32xf32, #tpu.memory_space<vmem>>
    %274 = tpu.memref_slice %arg9[%c0_i32_192] : memref<1x!tpu.dma_semaphore, #tpu.memory_space<semaphore_mem>> -> memref<1x!tpu.dma_semaphore, #tpu.memory_space<semaphore_mem>>
    %275 = tpu.memref_squeeze %274 : memref<1x!tpu.dma_semaphore, #tpu.memory_space<semaphore_mem>> -> memref<!tpu.dma_semaphore, #tpu.memory_space<semaphore_mem>>
    tpu.wait_dma2 semaphore(%275 : memref<!tpu.dma_semaphore, #tpu.memory_space<semaphore_mem>>) src(%272 : memref<1x32xf32, #tpu.memory_space<any>>) dst(%273 : memref<1x32xf32, #tpu.memory_space<vmem>>)
    %c0_i32_196 = arith.constant 0 : i32
    %c0_i32_197 = arith.constant 0 : i32
    %276 = tpu.memref_slice %arg2[%43, %c0_i32_197] : memref<50x32xf32, #tpu.memory_space<any>> -> memref<1x32xf32, #tpu.memory_space<any>>
    %c5_i32_198 = arith.constant 5 : i32
    %c0_i32_199 = arith.constant 0 : i32
    %277 = tpu.memref_slice %arg8[%c5_i32_198, %c0_i32_199] : memref<32x32xf32, #tpu.memory_space<vmem>> -> memref<1x32xf32, #tpu.memory_space<vmem>>
    %278 = tpu.memref_slice %arg9[%c0_i32_196] : memref<1x!tpu.dma_semaphore, #tpu.memory_space<semaphore_mem>> -> memref<1x!tpu.dma_semaphore, #tpu.memory_space<semaphore_mem>>
    %279 = tpu.memref_squeeze %278 : memref<1x!tpu.dma_semaphore, #tpu.memory_space<semaphore_mem>> -> memref<!tpu.dma_semaphore, #tpu.memory_space<semaphore_mem>>
    tpu.wait_dma2 semaphore(%279 : memref<!tpu.dma_semaphore, #tpu.memory_space<semaphore_mem>>) src(%276 : memref<1x32xf32, #tpu.memory_space<any>>) dst(%277 : memref<1x32xf32, #tpu.memory_space<vmem>>)
    %c0_i32_200 = arith.constant 0 : i32
    %c0_i32_201 = arith.constant 0 : i32
    %280 = tpu.memref_slice %arg2[%51, %c0_i32_201] : memref<50x32xf32, #tpu.memory_space<any>> -> memref<1x32xf32, #tpu.memory_space<any>>
    %c6_i32_202 = arith.constant 6 : i32
    %c0_i32_203 = arith.constant 0 : i32
    %281 = tpu.memref_slice %arg8[%c6_i32_202, %c0_i32_203] : memref<32x32xf32, #tpu.memory_space<vmem>> -> memref<1x32xf32, #tpu.memory_space<vmem>>
    %282 = tpu.memref_slice %arg9[%c0_i32_200] : memref<1x!tpu.dma_semaphore, #tpu.memory_space<semaphore_mem>> -> memref<1x!tpu.dma_semaphore, #tpu.memory_space<semaphore_mem>>
    %283 = tpu.memref_squeeze %282 : memref<1x!tpu.dma_semaphore, #tpu.memory_space<semaphore_mem>> -> memref<!tpu.dma_semaphore, #tpu.memory_space<semaphore_mem>>
    tpu.wait_dma2 semaphore(%283 : memref<!tpu.dma_semaphore, #tpu.memory_space<semaphore_mem>>) src(%280 : memref<1x32xf32, #tpu.memory_space<any>>) dst(%281 : memref<1x32xf32, #tpu.memory_space<vmem>>)
    %c0_i32_204 = arith.constant 0 : i32
    %c0_i32_205 = arith.constant 0 : i32
    %284 = tpu.memref_slice %arg2[%59, %c0_i32_205] : memref<50x32xf32, #tpu.memory_space<any>> -> memref<1x32xf32, #tpu.memory_space<any>>
    %c7_i32_206 = arith.constant 7 : i32
    %c0_i32_207 = arith.constant 0 : i32
    %285 = tpu.memref_slice %arg8[%c7_i32_206, %c0_i32_207] : memref<32x32xf32, #tpu.memory_space<vmem>> -> memref<1x32xf32, #tpu.memory_space<vmem>>
    %286 = tpu.memref_slice %arg9[%c0_i32_204] : memref<1x!tpu.dma_semaphore, #tpu.memory_space<semaphore_mem>> -> memref<1x!tpu.dma_semaphore, #tpu.memory_space<semaphore_mem>>
    %287 = tpu.memref_squeeze %286 : memref<1x!tpu.dma_semaphore, #tpu.memory_space<semaphore_mem>> -> memref<!tpu.dma_semaphore, #tpu.memory_space<semaphore_mem>>
    tpu.wait_dma2 semaphore(%287 : memref<!tpu.dma_semaphore, #tpu.memory_space<semaphore_mem>>) src(%284 : memref<1x32xf32, #tpu.memory_space<any>>) dst(%285 : memref<1x32xf32, #tpu.memory_space<vmem>>)
    %c0_i32_208 = arith.constant 0 : i32
    %c0_i32_209 = arith.constant 0 : i32
    %288 = tpu.memref_slice %arg2[%67, %c0_i32_209] : memref<50x32xf32, #tpu.memory_space<any>> -> memref<1x32xf32, #tpu.memory_space<any>>
    %c8_i32_210 = arith.constant 8 : i32
    %c0_i32_211 = arith.constant 0 : i32
    %289 = tpu.memref_slice %arg8[%c8_i32_210, %c0_i32_211] : memref<32x32xf32, #tpu.memory_space<vmem>> -> memref<1x32xf32, #tpu.memory_space<vmem>>
    %290 = tpu.memref_slice %arg9[%c0_i32_208] : memref<1x!tpu.dma_semaphore, #tpu.memory_space<semaphore_mem>> -> memref<1x!tpu.dma_semaphore, #tpu.memory_space<semaphore_mem>>
    %291 = tpu.memref_squeeze %290 : memref<1x!tpu.dma_semaphore, #tpu.memory_space<semaphore_mem>> -> memref<!tpu.dma_semaphore, #tpu.memory_space<semaphore_mem>>
    tpu.wait_dma2 semaphore(%291 : memref<!tpu.dma_semaphore, #tpu.memory_space<semaphore_mem>>) src(%288 : memref<1x32xf32, #tpu.memory_space<any>>) dst(%289 : memref<1x32xf32, #tpu.memory_space<vmem>>)
    %c0_i32_212 = arith.constant 0 : i32
    %c0_i32_213 = arith.constant 0 : i32
    %292 = tpu.memref_slice %arg2[%75, %c0_i32_213] : memref<50x32xf32, #tpu.memory_space<any>> -> memref<1x32xf32, #tpu.memory_space<any>>
    %c9_i32_214 = arith.constant 9 : i32
    %c0_i32_215 = arith.constant 0 : i32
    %293 = tpu.memref_slice %arg8[%c9_i32_214, %c0_i32_215] : memref<32x32xf32, #tpu.memory_space<vmem>> -> memref<1x32xf32, #tpu.memory_space<vmem>>
    %294 = tpu.memref_slice %arg9[%c0_i32_212] : memref<1x!tpu.dma_semaphore, #tpu.memory_space<semaphore_mem>> -> memref<1x!tpu.dma_semaphore, #tpu.memory_space<semaphore_mem>>
    %295 = tpu.memref_squeeze %294 : memref<1x!tpu.dma_semaphore, #tpu.memory_space<semaphore_mem>> -> memref<!tpu.dma_semaphore, #tpu.memory_space<semaphore_mem>>
    tpu.wait_dma2 semaphore(%295 : memref<!tpu.dma_semaphore, #tpu.memory_space<semaphore_mem>>) src(%292 : memref<1x32xf32, #tpu.memory_space<any>>) dst(%293 : memref<1x32xf32, #tpu.memory_space<vmem>>)
    %c0_i32_216 = arith.constant 0 : i32
    %c0_i32_217 = arith.constant 0 : i32
    %296 = tpu.memref_slice %arg2[%83, %c0_i32_217] : memref<50x32xf32, #tpu.memory_space<any>> -> memref<1x32xf32, #tpu.memory_space<any>>
    %c10_i32_218 = arith.constant 10 : i32
    %c0_i32_219 = arith.constant 0 : i32
    %297 = tpu.memref_slice %arg8[%c10_i32_218, %c0_i32_219] : memref<32x32xf32, #tpu.memory_space<vmem>> -> memref<1x32xf32, #tpu.memory_space<vmem>>
    %298 = tpu.memref_slice %arg9[%c0_i32_216] : memref<1x!tpu.dma_semaphore, #tpu.memory_space<semaphore_mem>> -> memref<1x!tpu.dma_semaphore, #tpu.memory_space<semaphore_mem>>
    %299 = tpu.memref_squeeze %298 : memref<1x!tpu.dma_semaphore, #tpu.memory_space<semaphore_mem>> -> memref<!tpu.dma_semaphore, #tpu.memory_space<semaphore_mem>>
    tpu.wait_dma2 semaphore(%299 : memref<!tpu.dma_semaphore, #tpu.memory_space<semaphore_mem>>) src(%296 : memref<1x32xf32, #tpu.memory_space<any>>) dst(%297 : memref<1x32xf32, #tpu.memory_space<vmem>>)
    %c0_i32_220 = arith.constant 0 : i32
    %c0_i32_221 = arith.constant 0 : i32
    %300 = tpu.memref_slice %arg2[%91, %c0_i32_221] : memref<50x32xf32, #tpu.memory_space<any>> -> memref<1x32xf32, #tpu.memory_space<any>>
    %c11_i32_222 = arith.constant 11 : i32
    %c0_i32_223 = arith.constant 0 : i32
    %301 = tpu.memref_slice %arg8[%c11_i32_222, %c0_i32_223] : memref<32x32xf32, #tpu.memory_space<vmem>> -> memref<1x32xf32, #tpu.memory_space<vmem>>
    %302 = tpu.memref_slice %arg9[%c0_i32_220] : memref<1x!tpu.dma_semaphore, #tpu.memory_space<semaphore_mem>> -> memref<1x!tpu.dma_semaphore, #tpu.memory_space<semaphore_mem>>
    %303 = tpu.memref_squeeze %302 : memref<1x!tpu.dma_semaphore, #tpu.memory_space<semaphore_mem>> -> memref<!tpu.dma_semaphore, #tpu.memory_space<semaphore_mem>>
    tpu.wait_dma2 semaphore(%303 : memref<!tpu.dma_semaphore, #tpu.memory_space<semaphore_mem>>) src(%300 : memref<1x32xf32, #tpu.memory_space<any>>) dst(%301 : memref<1x32xf32, #tpu.memory_space<vmem>>)
    %c0_i32_224 = arith.constant 0 : i32
    %c0_i32_225 = arith.constant 0 : i32
    %304 = tpu.memref_slice %arg2[%99, %c0_i32_225] : memref<50x32xf32, #tpu.memory_space<any>> -> memref<1x32xf32, #tpu.memory_space<any>>
    %c12_i32_226 = arith.constant 12 : i32
    %c0_i32_227 = arith.constant 0 : i32
    %305 = tpu.memref_slice %arg8[%c12_i32_226, %c0_i32_227] : memref<32x32xf32, #tpu.memory_space<vmem>> -> memref<1x32xf32, #tpu.memory_space<vmem>>
    %306 = tpu.memref_slice %arg9[%c0_i32_224] : memref<1x!tpu.dma_semaphore, #tpu.memory_space<semaphore_mem>> -> memref<1x!tpu.dma_semaphore, #tpu.memory_space<semaphore_mem>>
    %307 = tpu.memref_squeeze %306 : memref<1x!tpu.dma_semaphore, #tpu.memory_space<semaphore_mem>> -> memref<!tpu.dma_semaphore, #tpu.memory_space<semaphore_mem>>
    tpu.wait_dma2 semaphore(%307 : memref<!tpu.dma_semaphore, #tpu.memory_space<semaphore_mem>>) src(%304 : memref<1x32xf32, #tpu.memory_space<any>>) dst(%305 : memref<1x32xf32, #tpu.memory_space<vmem>>)
    %c0_i32_228 = arith.constant 0 : i32
    %c0_i32_229 = arith.constant 0 : i32
    %308 = tpu.memref_slice %arg2[%107, %c0_i32_229] : memref<50x32xf32, #tpu.memory_space<any>> -> memref<1x32xf32, #tpu.memory_space<any>>
    %c13_i32_230 = arith.constant 13 : i32
    %c0_i32_231 = arith.constant 0 : i32
    %309 = tpu.memref_slice %arg8[%c13_i32_230, %c0_i32_231] : memref<32x32xf32, #tpu.memory_space<vmem>> -> memref<1x32xf32, #tpu.memory_space<vmem>>
    %310 = tpu.memref_slice %arg9[%c0_i32_228] : memref<1x!tpu.dma_semaphore, #tpu.memory_space<semaphore_mem>> -> memref<1x!tpu.dma_semaphore, #tpu.memory_space<semaphore_mem>>
    %311 = tpu.memref_squeeze %310 : memref<1x!tpu.dma_semaphore, #tpu.memory_space<semaphore_mem>> -> memref<!tpu.dma_semaphore, #tpu.memory_space<semaphore_mem>>
    tpu.wait_dma2 semaphore(%311 : memref<!tpu.dma_semaphore, #tpu.memory_space<semaphore_mem>>) src(%308 : memref<1x32xf32, #tpu.memory_space<any>>) dst(%309 : memref<1x32xf32, #tpu.memory_space<vmem>>)
    %c0_i32_232 = arith.constant 0 : i32
    %c0_i32_233 = arith.constant 0 : i32
    %312 = tpu.memref_slice %arg2[%115, %c0_i32_233] : memref<50x32xf32, #tpu.memory_space<any>> -> memref<1x32xf32, #tpu.memory_space<any>>
    %c14_i32_234 = arith.constant 14 : i32
    %c0_i32_235 = arith.constant 0 : i32
    %313 = tpu.memref_slice %arg8[%c14_i32_234, %c0_i32_235] : memref<32x32xf32, #tpu.memory_space<vmem>> -> memref<1x32xf32, #tpu.memory_space<vmem>>
    %314 = tpu.memref_slice %arg9[%c0_i32_232] : memref<1x!tpu.dma_semaphore, #tpu.memory_space<semaphore_mem>> -> memref<1x!tpu.dma_semaphore, #tpu.memory_space<semaphore_mem>>
    %315 = tpu.memref_squeeze %314 : memref<1x!tpu.dma_semaphore, #tpu.memory_space<semaphore_mem>> -> memref<!tpu.dma_semaphore, #tpu.memory_space<semaphore_mem>>
    tpu.wait_dma2 semaphore(%315 : memref<!tpu.dma_semaphore, #tpu.memory_space<semaphore_mem>>) src(%312 : memref<1x32xf32, #tpu.memory_space<any>>) dst(%313 : memref<1x32xf32, #tpu.memory_space<vmem>>)
    %c0_i32_236 = arith.constant 0 : i32
    %c0_i32_237 = arith.constant 0 : i32
    %316 = tpu.memref_slice %arg2[%123, %c0_i32_237] : memref<50x32xf32, #tpu.memory_space<any>> -> memref<1x32xf32, #tpu.memory_space<any>>
    %c15_i32_238 = arith.constant 15 : i32
    %c0_i32_239 = arith.constant 0 : i32
    %317 = tpu.memref_slice %arg8[%c15_i32_238, %c0_i32_239] : memref<32x32xf32, #tpu.memory_space<vmem>> -> memref<1x32xf32, #tpu.memory_space<vmem>>
    %318 = tpu.memref_slice %arg9[%c0_i32_236] : memref<1x!tpu.dma_semaphore, #tpu.memory_space<semaphore_mem>> -> memref<1x!tpu.dma_semaphore, #tpu.memory_space<semaphore_mem>>
    %319 = tpu.memref_squeeze %318 : memref<1x!tpu.dma_semaphore, #tpu.memory_space<semaphore_mem>> -> memref<!tpu.dma_semaphore, #tpu.memory_space<semaphore_mem>>
    tpu.wait_dma2 semaphore(%319 : memref<!tpu.dma_semaphore, #tpu.memory_space<semaphore_mem>>) src(%316 : memref<1x32xf32, #tpu.memory_space<any>>) dst(%317 : memref<1x32xf32, #tpu.memory_space<vmem>>)
    %c0_i32_240 = arith.constant 0 : i32
    %c0_i32_241 = arith.constant 0 : i32
    %320 = tpu.memref_slice %arg2[%131, %c0_i32_241] : memref<50x32xf32, #tpu.memory_space<any>> -> memref<1x32xf32, #tpu.memory_space<any>>
    %c16_i32_242 = arith.constant 16 : i32
    %c0_i32_243 = arith.constant 0 : i32
    %321 = tpu.memref_slice %arg8[%c16_i32_242, %c0_i32_243] : memref<32x32xf32, #tpu.memory_space<vmem>> -> memref<1x32xf32, #tpu.memory_space<vmem>>
    %322 = tpu.memref_slice %arg9[%c0_i32_240] : memref<1x!tpu.dma_semaphore, #tpu.memory_space<semaphore_mem>> -> memref<1x!tpu.dma_semaphore, #tpu.memory_space<semaphore_mem>>
    %323 = tpu.memref_squeeze %322 : memref<1x!tpu.dma_semaphore, #tpu.memory_space<semaphore_mem>> -> memref<!tpu.dma_semaphore, #tpu.memory_space<semaphore_mem>>
    tpu.wait_dma2 semaphore(%323 : memref<!tpu.dma_semaphore, #tpu.memory_space<semaphore_mem>>) src(%320 : memref<1x32xf32, #tpu.memory_space<any>>) dst(%321 : memref<1x32xf32, #tpu.memory_space<vmem>>)
    %c0_i32_244 = arith.constant 0 : i32
    %c0_i32_245 = arith.constant 0 : i32
    %324 = tpu.memref_slice %arg2[%139, %c0_i32_245] : memref<50x32xf32, #tpu.memory_space<any>> -> memref<1x32xf32, #tpu.memory_space<any>>
    %c17_i32_246 = arith.constant 17 : i32
    %c0_i32_247 = arith.constant 0 : i32
    %325 = tpu.memref_slice %arg8[%c17_i32_246, %c0_i32_247] : memref<32x32xf32, #tpu.memory_space<vmem>> -> memref<1x32xf32, #tpu.memory_space<vmem>>
    %326 = tpu.memref_slice %arg9[%c0_i32_244] : memref<1x!tpu.dma_semaphore, #tpu.memory_space<semaphore_mem>> -> memref<1x!tpu.dma_semaphore, #tpu.memory_space<semaphore_mem>>
    %327 = tpu.memref_squeeze %326 : memref<1x!tpu.dma_semaphore, #tpu.memory_space<semaphore_mem>> -> memref<!tpu.dma_semaphore, #tpu.memory_space<semaphore_mem>>
    tpu.wait_dma2 semaphore(%327 : memref<!tpu.dma_semaphore, #tpu.memory_space<semaphore_mem>>) src(%324 : memref<1x32xf32, #tpu.memory_space<any>>) dst(%325 : memref<1x32xf32, #tpu.memory_space<vmem>>)
    %c0_i32_248 = arith.constant 0 : i32
    %c0_i32_249 = arith.constant 0 : i32
    %328 = tpu.memref_slice %arg2[%147, %c0_i32_249] : memref<50x32xf32, #tpu.memory_space<any>> -> memref<1x32xf32, #tpu.memory_space<any>>
    %c18_i32_250 = arith.constant 18 : i32
    %c0_i32_251 = arith.constant 0 : i32
    %329 = tpu.memref_slice %arg8[%c18_i32_250, %c0_i32_251] : memref<32x32xf32, #tpu.memory_space<vmem>> -> memref<1x32xf32, #tpu.memory_space<vmem>>
    %330 = tpu.memref_slice %arg9[%c0_i32_248] : memref<1x!tpu.dma_semaphore, #tpu.memory_space<semaphore_mem>> -> memref<1x!tpu.dma_semaphore, #tpu.memory_space<semaphore_mem>>
    %331 = tpu.memref_squeeze %330 : memref<1x!tpu.dma_semaphore, #tpu.memory_space<semaphore_mem>> -> memref<!tpu.dma_semaphore, #tpu.memory_space<semaphore_mem>>
    tpu.wait_dma2 semaphore(%331 : memref<!tpu.dma_semaphore, #tpu.memory_space<semaphore_mem>>) src(%328 : memref<1x32xf32, #tpu.memory_space<any>>) dst(%329 : memref<1x32xf32, #tpu.memory_space<vmem>>)
    %c0_i32_252 = arith.constant 0 : i32
    %c0_i32_253 = arith.constant 0 : i32
    %332 = tpu.memref_slice %arg2[%155, %c0_i32_253] : memref<50x32xf32, #tpu.memory_space<any>> -> memref<1x32xf32, #tpu.memory_space<any>>
    %c19_i32_254 = arith.constant 19 : i32
    %c0_i32_255 = arith.constant 0 : i32
    %333 = tpu.memref_slice %arg8[%c19_i32_254, %c0_i32_255] : memref<32x32xf32, #tpu.memory_space<vmem>> -> memref<1x32xf32, #tpu.memory_space<vmem>>
    %334 = tpu.memref_slice %arg9[%c0_i32_252] : memref<1x!tpu.dma_semaphore, #tpu.memory_space<semaphore_mem>> -> memref<1x!tpu.dma_semaphore, #tpu.memory_space<semaphore_mem>>
    %335 = tpu.memref_squeeze %334 : memref<1x!tpu.dma_semaphore, #tpu.memory_space<semaphore_mem>> -> memref<!tpu.dma_semaphore, #tpu.memory_space<semaphore_mem>>
    tpu.wait_dma2 semaphore(%335 : memref<!tpu.dma_semaphore, #tpu.memory_space<semaphore_mem>>) src(%332 : memref<1x32xf32, #tpu.memory_space<any>>) dst(%333 : memref<1x32xf32, #tpu.memory_space<vmem>>)
    %c0_i32_256 = arith.constant 0 : i32
    %c0_i32_257 = arith.constant 0 : i32
    %336 = tpu.memref_slice %arg2[%163, %c0_i32_257] : memref<50x32xf32, #tpu.memory_space<any>> -> memref<1x32xf32, #tpu.memory_space<any>>
    %c20_i32_258 = arith.constant 20 : i32
    %c0_i32_259 = arith.constant 0 : i32
    %337 = tpu.memref_slice %arg8[%c20_i32_258, %c0_i32_259] : memref<32x32xf32, #tpu.memory_space<vmem>> -> memref<1x32xf32, #tpu.memory_space<vmem>>
    %338 = tpu.memref_slice %arg9[%c0_i32_256] : memref<1x!tpu.dma_semaphore, #tpu.memory_space<semaphore_mem>> -> memref<1x!tpu.dma_semaphore, #tpu.memory_space<semaphore_mem>>
    %339 = tpu.memref_squeeze %338 : memref<1x!tpu.dma_semaphore, #tpu.memory_space<semaphore_mem>> -> memref<!tpu.dma_semaphore, #tpu.memory_space<semaphore_mem>>
    tpu.wait_dma2 semaphore(%339 : memref<!tpu.dma_semaphore, #tpu.memory_space<semaphore_mem>>) src(%336 : memref<1x32xf32, #tpu.memory_space<any>>) dst(%337 : memref<1x32xf32, #tpu.memory_space<vmem>>)
    %c0_i32_260 = arith.constant 0 : i32
    %c0_i32_261 = arith.constant 0 : i32
    %340 = tpu.memref_slice %arg2[%171, %c0_i32_261] : memref<50x32xf32, #tpu.memory_space<any>> -> memref<1x32xf32, #tpu.memory_space<any>>
    %c21_i32_262 = arith.constant 21 : i32
    %c0_i32_263 = arith.constant 0 : i32
    %341 = tpu.memref_slice %arg8[%c21_i32_262, %c0_i32_263] : memref<32x32xf32, #tpu.memory_space<vmem>> -> memref<1x32xf32, #tpu.memory_space<vmem>>
    %342 = tpu.memref_slice %arg9[%c0_i32_260] : memref<1x!tpu.dma_semaphore, #tpu.memory_space<semaphore_mem>> -> memref<1x!tpu.dma_semaphore, #tpu.memory_space<semaphore_mem>>
    %343 = tpu.memref_squeeze %342 : memref<1x!tpu.dma_semaphore, #tpu.memory_space<semaphore_mem>> -> memref<!tpu.dma_semaphore, #tpu.memory_space<semaphore_mem>>
    tpu.wait_dma2 semaphore(%343 : memref<!tpu.dma_semaphore, #tpu.memory_space<semaphore_mem>>) src(%340 : memref<1x32xf32, #tpu.memory_space<any>>) dst(%341 : memref<1x32xf32, #tpu.memory_space<vmem>>)
    %c0_i32_264 = arith.constant 0 : i32
    %c0_i32_265 = arith.constant 0 : i32
    %344 = tpu.memref_slice %arg2[%179, %c0_i32_265] : memref<50x32xf32, #tpu.memory_space<any>> -> memref<1x32xf32, #tpu.memory_space<any>>
    %c22_i32_266 = arith.constant 22 : i32
    %c0_i32_267 = arith.constant 0 : i32
    %345 = tpu.memref_slice %arg8[%c22_i32_266, %c0_i32_267] : memref<32x32xf32, #tpu.memory_space<vmem>> -> memref<1x32xf32, #tpu.memory_space<vmem>>
    %346 = tpu.memref_slice %arg9[%c0_i32_264] : memref<1x!tpu.dma_semaphore, #tpu.memory_space<semaphore_mem>> -> memref<1x!tpu.dma_semaphore, #tpu.memory_space<semaphore_mem>>
    %347 = tpu.memref_squeeze %346 : memref<1x!tpu.dma_semaphore, #tpu.memory_space<semaphore_mem>> -> memref<!tpu.dma_semaphore, #tpu.memory_space<semaphore_mem>>
    tpu.wait_dma2 semaphore(%347 : memref<!tpu.dma_semaphore, #tpu.memory_space<semaphore_mem>>) src(%344 : memref<1x32xf32, #tpu.memory_space<any>>) dst(%345 : memref<1x32xf32, #tpu.memory_space<vmem>>)
    %c0_i32_268 = arith.constant 0 : i32
    %c0_i32_269 = arith.constant 0 : i32
    %348 = tpu.memref_slice %arg2[%187, %c0_i32_269] : memref<50x32xf32, #tpu.memory_space<any>> -> memref<1x32xf32, #tpu.memory_space<any>>
    %c23_i32_270 = arith.constant 23 : i32
    %c0_i32_271 = arith.constant 0 : i32
    %349 = tpu.memref_slice %arg8[%c23_i32_270, %c0_i32_271] : memref<32x32xf32, #tpu.memory_space<vmem>> -> memref<1x32xf32, #tpu.memory_space<vmem>>
    %350 = tpu.memref_slice %arg9[%c0_i32_268] : memref<1x!tpu.dma_semaphore, #tpu.memory_space<semaphore_mem>> -> memref<1x!tpu.dma_semaphore, #tpu.memory_space<semaphore_mem>>
    %351 = tpu.memref_squeeze %350 : memref<1x!tpu.dma_semaphore, #tpu.memory_space<semaphore_mem>> -> memref<!tpu.dma_semaphore, #tpu.memory_space<semaphore_mem>>
    tpu.wait_dma2 semaphore(%351 : memref<!tpu.dma_semaphore, #tpu.memory_space<semaphore_mem>>) src(%348 : memref<1x32xf32, #tpu.memory_space<any>>) dst(%349 : memref<1x32xf32, #tpu.memory_space<vmem>>)
    %c0_i32_272 = arith.constant 0 : i32
    %c0_i32_273 = arith.constant 0 : i32
    %352 = tpu.memref_slice %arg2[%195, %c0_i32_273] : memref<50x32xf32, #tpu.memory_space<any>> -> memref<1x32xf32, #tpu.memory_space<any>>
    %c24_i32_274 = arith.constant 24 : i32
    %c0_i32_275 = arith.constant 0 : i32
    %353 = tpu.memref_slice %arg8[%c24_i32_274, %c0_i32_275] : memref<32x32xf32, #tpu.memory_space<vmem>> -> memref<1x32xf32, #tpu.memory_space<vmem>>
    %354 = tpu.memref_slice %arg9[%c0_i32_272] : memref<1x!tpu.dma_semaphore, #tpu.memory_space<semaphore_mem>> -> memref<1x!tpu.dma_semaphore, #tpu.memory_space<semaphore_mem>>
    %355 = tpu.memref_squeeze %354 : memref<1x!tpu.dma_semaphore, #tpu.memory_space<semaphore_mem>> -> memref<!tpu.dma_semaphore, #tpu.memory_space<semaphore_mem>>
    tpu.wait_dma2 semaphore(%355 : memref<!tpu.dma_semaphore, #tpu.memory_space<semaphore_mem>>) src(%352 : memref<1x32xf32, #tpu.memory_space<any>>) dst(%353 : memref<1x32xf32, #tpu.memory_space<vmem>>)
    %c0_i32_276 = arith.constant 0 : i32
    %c0_i32_277 = arith.constant 0 : i32
    %356 = tpu.memref_slice %arg2[%203, %c0_i32_277] : memref<50x32xf32, #tpu.memory_space<any>> -> memref<1x32xf32, #tpu.memory_space<any>>
    %c25_i32_278 = arith.constant 25 : i32
    %c0_i32_279 = arith.constant 0 : i32
    %357 = tpu.memref_slice %arg8[%c25_i32_278, %c0_i32_279] : memref<32x32xf32, #tpu.memory_space<vmem>> -> memref<1x32xf32, #tpu.memory_space<vmem>>
    %358 = tpu.memref_slice %arg9[%c0_i32_276] : memref<1x!tpu.dma_semaphore, #tpu.memory_space<semaphore_mem>> -> memref<1x!tpu.dma_semaphore, #tpu.memory_space<semaphore_mem>>
    %359 = tpu.memref_squeeze %358 : memref<1x!tpu.dma_semaphore, #tpu.memory_space<semaphore_mem>> -> memref<!tpu.dma_semaphore, #tpu.memory_space<semaphore_mem>>
    tpu.wait_dma2 semaphore(%359 : memref<!tpu.dma_semaphore, #tpu.memory_space<semaphore_mem>>) src(%356 : memref<1x32xf32, #tpu.memory_space<any>>) dst(%357 : memref<1x32xf32, #tpu.memory_space<vmem>>)
    %c0_i32_280 = arith.constant 0 : i32
    %c0_i32_281 = arith.constant 0 : i32
    %360 = tpu.memref_slice %arg2[%211, %c0_i32_281] : memref<50x32xf32, #tpu.memory_space<any>> -> memref<1x32xf32, #tpu.memory_space<any>>
    %c26_i32_282 = arith.constant 26 : i32
    %c0_i32_283 = arith.constant 0 : i32
    %361 = tpu.memref_slice %arg8[%c26_i32_282, %c0_i32_283] : memref<32x32xf32, #tpu.memory_space<vmem>> -> memref<1x32xf32, #tpu.memory_space<vmem>>
    %362 = tpu.memref_slice %arg9[%c0_i32_280] : memref<1x!tpu.dma_semaphore, #tpu.memory_space<semaphore_mem>> -> memref<1x!tpu.dma_semaphore, #tpu.memory_space<semaphore_mem>>
    %363 = tpu.memref_squeeze %362 : memref<1x!tpu.dma_semaphore, #tpu.memory_space<semaphore_mem>> -> memref<!tpu.dma_semaphore, #tpu.memory_space<semaphore_mem>>
    tpu.wait_dma2 semaphore(%363 : memref<!tpu.dma_semaphore, #tpu.memory_space<semaphore_mem>>) src(%360 : memref<1x32xf32, #tpu.memory_space<any>>) dst(%361 : memref<1x32xf32, #tpu.memory_space<vmem>>)
    %c0_i32_284 = arith.constant 0 : i32
    %c0_i32_285 = arith.constant 0 : i32
    %364 = tpu.memref_slice %arg2[%219, %c0_i32_285] : memref<50x32xf32, #tpu.memory_space<any>> -> memref<1x32xf32, #tpu.memory_space<any>>
    %c27_i32_286 = arith.constant 27 : i32
    %c0_i32_287 = arith.constant 0 : i32
    %365 = tpu.memref_slice %arg8[%c27_i32_286, %c0_i32_287] : memref<32x32xf32, #tpu.memory_space<vmem>> -> memref<1x32xf32, #tpu.memory_space<vmem>>
    %366 = tpu.memref_slice %arg9[%c0_i32_284] : memref<1x!tpu.dma_semaphore, #tpu.memory_space<semaphore_mem>> -> memref<1x!tpu.dma_semaphore, #tpu.memory_space<semaphore_mem>>
    %367 = tpu.memref_squeeze %366 : memref<1x!tpu.dma_semaphore, #tpu.memory_space<semaphore_mem>> -> memref<!tpu.dma_semaphore, #tpu.memory_space<semaphore_mem>>
    tpu.wait_dma2 semaphore(%367 : memref<!tpu.dma_semaphore, #tpu.memory_space<semaphore_mem>>) src(%364 : memref<1x32xf32, #tpu.memory_space<any>>) dst(%365 : memref<1x32xf32, #tpu.memory_space<vmem>>)
    %c0_i32_288 = arith.constant 0 : i32
    %c0_i32_289 = arith.constant 0 : i32
    %368 = tpu.memref_slice %arg2[%227, %c0_i32_289] : memref<50x32xf32, #tpu.memory_space<any>> -> memref<1x32xf32, #tpu.memory_space<any>>
    %c28_i32_290 = arith.constant 28 : i32
    %c0_i32_291 = arith.constant 0 : i32
    %369 = tpu.memref_slice %arg8[%c28_i32_290, %c0_i32_291] : memref<32x32xf32, #tpu.memory_space<vmem>> -> memref<1x32xf32, #tpu.memory_space<vmem>>
    %370 = tpu.memref_slice %arg9[%c0_i32_288] : memref<1x!tpu.dma_semaphore, #tpu.memory_space<semaphore_mem>> -> memref<1x!tpu.dma_semaphore, #tpu.memory_space<semaphore_mem>>
    %371 = tpu.memref_squeeze %370 : memref<1x!tpu.dma_semaphore, #tpu.memory_space<semaphore_mem>> -> memref<!tpu.dma_semaphore, #tpu.memory_space<semaphore_mem>>
    tpu.wait_dma2 semaphore(%371 : memref<!tpu.dma_semaphore, #tpu.memory_space<semaphore_mem>>) src(%368 : memref<1x32xf32, #tpu.memory_space<any>>) dst(%369 : memref<1x32xf32, #tpu.memory_space<vmem>>)
    %c0_i32_292 = arith.constant 0 : i32
    %c0_i32_293 = arith.constant 0 : i32
    %372 = tpu.memref_slice %arg2[%235, %c0_i32_293] : memref<50x32xf32, #tpu.memory_space<any>> -> memref<1x32xf32, #tpu.memory_space<any>>
    %c29_i32_294 = arith.constant 29 : i32
    %c0_i32_295 = arith.constant 0 : i32
    %373 = tpu.memref_slice %arg8[%c29_i32_294, %c0_i32_295] : memref<32x32xf32, #tpu.memory_space<vmem>> -> memref<1x32xf32, #tpu.memory_space<vmem>>
    %374 = tpu.memref_slice %arg9[%c0_i32_292] : memref<1x!tpu.dma_semaphore, #tpu.memory_space<semaphore_mem>> -> memref<1x!tpu.dma_semaphore, #tpu.memory_space<semaphore_mem>>
    %375 = tpu.memref_squeeze %374 : memref<1x!tpu.dma_semaphore, #tpu.memory_space<semaphore_mem>> -> memref<!tpu.dma_semaphore, #tpu.memory_space<semaphore_mem>>
    tpu.wait_dma2 semaphore(%375 : memref<!tpu.dma_semaphore, #tpu.memory_space<semaphore_mem>>) src(%372 : memref<1x32xf32, #tpu.memory_space<any>>) dst(%373 : memref<1x32xf32, #tpu.memory_space<vmem>>)
    %c0_i32_296 = arith.constant 0 : i32
    %c0_i32_297 = arith.constant 0 : i32
    %376 = tpu.memref_slice %arg2[%243, %c0_i32_297] : memref<50x32xf32, #tpu.memory_space<any>> -> memref<1x32xf32, #tpu.memory_space<any>>
    %c30_i32_298 = arith.constant 30 : i32
    %c0_i32_299 = arith.constant 0 : i32
    %377 = tpu.memref_slice %arg8[%c30_i32_298, %c0_i32_299] : memref<32x32xf32, #tpu.memory_space<vmem>> -> memref<1x32xf32, #tpu.memory_space<vmem>>
    %378 = tpu.memref_slice %arg9[%c0_i32_296] : memref<1x!tpu.dma_semaphore, #tpu.memory_space<semaphore_mem>> -> memref<1x!tpu.dma_semaphore, #tpu.memory_space<semaphore_mem>>
    %379 = tpu.memref_squeeze %378 : memref<1x!tpu.dma_semaphore, #tpu.memory_space<semaphore_mem>> -> memref<!tpu.dma_semaphore, #tpu.memory_space<semaphore_mem>>
    tpu.wait_dma2 semaphore(%379 : memref<!tpu.dma_semaphore, #tpu.memory_space<semaphore_mem>>) src(%376 : memref<1x32xf32, #tpu.memory_space<any>>) dst(%377 : memref<1x32xf32, #tpu.memory_space<vmem>>)
    %c0_i32_300 = arith.constant 0 : i32
    %c0_i32_301 = arith.constant 0 : i32
    %380 = tpu.memref_slice %arg2[%251, %c0_i32_301] : memref<50x32xf32, #tpu.memory_space<any>> -> memref<1x32xf32, #tpu.memory_space<any>>
    %c31_i32_302 = arith.constant 31 : i32
    %c0_i32_303 = arith.constant 0 : i32
    %381 = tpu.memref_slice %arg8[%c31_i32_302, %c0_i32_303] : memref<32x32xf32, #tpu.memory_space<vmem>> -> memref<1x32xf32, #tpu.memory_space<vmem>>
    %382 = tpu.memref_slice %arg9[%c0_i32_300] : memref<1x!tpu.dma_semaphore, #tpu.memory_space<semaphore_mem>> -> memref<1x!tpu.dma_semaphore, #tpu.memory_space<semaphore_mem>>
    %383 = tpu.memref_squeeze %382 : memref<1x!tpu.dma_semaphore, #tpu.memory_space<semaphore_mem>> -> memref<!tpu.dma_semaphore, #tpu.memory_space<semaphore_mem>>
    tpu.wait_dma2 semaphore(%383 : memref<!tpu.dma_semaphore, #tpu.memory_space<semaphore_mem>>) src(%380 : memref<1x32xf32, #tpu.memory_space<any>>) dst(%381 : memref<1x32xf32, #tpu.memory_space<vmem>>)
    %c0_304 = arith.constant 0 : index
    %c0_305 = arith.constant 0 : index
    %384 = vector.load %arg8[%c0_304, %c0_305] : memref<32x32xf32, #tpu.memory_space<vmem>>, vector<32x32xf32>
    %385 = arith.truncf %384 : vector<32x32xf32> to vector<32x32xbf16>
    %c0_306 = arith.constant 0 : index
    %c0_307 = arith.constant 0 : index
    %386 = vector.load %arg3[%c0_306, %c0_307] : memref<32x128xbf16, #tpu.memory_space<vmem>>, vector<32x128xbf16>
    %cst = arith.constant dense<0.000000e+00> : vector<32x128xf32>
    %387 = tpu.matmul %385, %386, %cst {dimension_numbers = #tpu.dot_dimension_numbers<[1], [0], [0], [1], [0, 0, 1, 1], [], []>} : vector<32x32xbf16>, vector<32x128xbf16>, vector<32x128xf32> -> vector<32x128xf32>
    %c0_308 = arith.constant 0 : index
    %c0_309 = arith.constant 0 : index
    %388 = vector.load %arg5[%c0_308, %c0_309] : memref<5x128xf32, #tpu.memory_space<vmem>>, vector<5x128xf32>
    %389 = vector.extract_strided_slice %387 {offsets = [1, 0], sizes = [31, 128], strides = [1, 1]} : vector<32x128xf32> to vector<31x128xf32>
    %390 = vector.extract_strided_slice %387 {offsets = [0, 0], sizes = [1, 128], strides = [1, 1]} : vector<32x128xf32> to vector<1x128xf32>
    %391 = tpu.concatenate %389, %390 in 0 : vector<31x128xf32>, vector<1x128xf32> -> vector<32x128xf32>
    %392 = vector.extract_strided_slice %391 {offsets = [0, 8], sizes = [32, 120], strides = [1, 1]} : vector<32x128xf32> to vector<32x120xf32>
    %393 = vector.extract_strided_slice %391 {offsets = [0, 0], sizes = [32, 8], strides = [1, 1]} : vector<32x128xf32> to vector<32x8xf32>
    %394 = tpu.concatenate %392, %393 in 1 : vector<32x120xf32>, vector<32x8xf32> -> vector<32x128xf32>
    %395 = vector.extract_strided_slice %388 {offsets = [1, 0], sizes = [1, 128], strides = [1, 1]} : vector<5x128xf32> to vector<1x128xf32>
    %396 = vector.broadcast %395 : vector<1x128xf32> to vector<32x128xf32>
    %397 = arith.mulf %394, %396 : vector<32x128xf32>
    %398 = arith.addf %387, %397 : vector<32x128xf32>
    %399 = vector.extract_strided_slice %387 {offsets = [2, 0], sizes = [30, 128], strides = [1, 1]} : vector<32x128xf32> to vector<30x128xf32>
    %400 = vector.extract_strided_slice %387 {offsets = [0, 0], sizes = [2, 128], strides = [1, 1]} : vector<32x128xf32> to vector<2x128xf32>
    %401 = tpu.concatenate %399, %400 in 0 : vector<30x128xf32>, vector<2x128xf32> -> vector<32x128xf32>
    %402 = vector.extract_strided_slice %401 {offsets = [0, 16], sizes = [32, 112], strides = [1, 1]} : vector<32x128xf32> to vector<32x112xf32>
    %403 = vector.extract_strided_slice %401 {offsets = [0, 0], sizes = [32, 16], strides = [1, 1]} : vector<32x128xf32> to vector<32x16xf32>
    %404 = tpu.concatenate %402, %403 in 1 : vector<32x112xf32>, vector<32x16xf32> -> vector<32x128xf32>
    %405 = vector.extract_strided_slice %388 {offsets = [2, 0], sizes = [1, 128], strides = [1, 1]} : vector<5x128xf32> to vector<1x128xf32>
    %406 = vector.broadcast %405 : vector<1x128xf32> to vector<32x128xf32>
    %407 = arith.mulf %404, %406 : vector<32x128xf32>
    %408 = arith.addf %398, %407 : vector<32x128xf32>
    %409 = vector.extract_strided_slice %387 {offsets = [3, 0], sizes = [29, 128], strides = [1, 1]} : vector<32x128xf32> to vector<29x128xf32>
    %410 = vector.extract_strided_slice %387 {offsets = [0, 0], sizes = [3, 128], strides = [1, 1]} : vector<32x128xf32> to vector<3x128xf32>
    %411 = tpu.concatenate %409, %410 in 0 : vector<29x128xf32>, vector<3x128xf32> -> vector<32x128xf32>
    %412 = vector.extract_strided_slice %411 {offsets = [0, 24], sizes = [32, 104], strides = [1, 1]} : vector<32x128xf32> to vector<32x104xf32>
    %413 = vector.extract_strided_slice %411 {offsets = [0, 0], sizes = [32, 24], strides = [1, 1]} : vector<32x128xf32> to vector<32x24xf32>
    %414 = tpu.concatenate %412, %413 in 1 : vector<32x104xf32>, vector<32x24xf32> -> vector<32x128xf32>
    %415 = vector.extract_strided_slice %388 {offsets = [3, 0], sizes = [1, 128], strides = [1, 1]} : vector<5x128xf32> to vector<1x128xf32>
    %416 = vector.broadcast %415 : vector<1x128xf32> to vector<32x128xf32>
    %417 = arith.mulf %414, %416 : vector<32x128xf32>
    %418 = arith.addf %408, %417 : vector<32x128xf32>
    %419 = vector.extract_strided_slice %387 {offsets = [4, 0], sizes = [28, 128], strides = [1, 1]} : vector<32x128xf32> to vector<28x128xf32>
    %420 = vector.extract_strided_slice %387 {offsets = [0, 0], sizes = [4, 128], strides = [1, 1]} : vector<32x128xf32> to vector<4x128xf32>
    %421 = tpu.concatenate %419, %420 in 0 : vector<28x128xf32>, vector<4x128xf32> -> vector<32x128xf32>
    %422 = vector.extract_strided_slice %421 {offsets = [0, 32], sizes = [32, 96], strides = [1, 1]} : vector<32x128xf32> to vector<32x96xf32>
    %423 = vector.extract_strided_slice %421 {offsets = [0, 0], sizes = [32, 32], strides = [1, 1]} : vector<32x128xf32> to vector<32x32xf32>
    %424 = tpu.concatenate %422, %423 in 1 : vector<32x96xf32>, vector<32x32xf32> -> vector<32x128xf32>
    %425 = vector.extract_strided_slice %388 {offsets = [4, 0], sizes = [1, 128], strides = [1, 1]} : vector<5x128xf32> to vector<1x128xf32>
    %426 = vector.broadcast %425 : vector<1x128xf32> to vector<32x128xf32>
    %427 = arith.mulf %424, %426 : vector<32x128xf32>
    %428 = arith.addf %418, %427 : vector<32x128xf32>
    %c0_310 = arith.constant 0 : index
    %c0_311 = arith.constant 0 : index
    %429 = vector.load %arg4[%c0_310, %c0_311] : memref<1x128xf32, #tpu.memory_space<vmem>>, vector<1x128xf32>
    %430 = vector.broadcast %429 : vector<1x128xf32> to vector<32x128xf32>
    %431 = arith.addf %428, %430 : vector<32x128xf32>
    %cst_312 = arith.constant 0.000000e+00 : f32
    %432 = vector.broadcast %cst_312 : f32 to vector<32x128xf32>
    %433 = arith.maximumf %431, %432 : vector<32x128xf32>
    %434 = vector.shape_cast %433 : vector<32x128xf32> to vector<2x16x128xf32>
    %c0_313 = arith.constant 0 : index
    %c0_314 = arith.constant 0 : index
    %435 = vector.load %arg6[%c0_313, %c0_314] : memref<16x128xf32, #tpu.memory_space<vmem>>, vector<16x128xf32>
    %436 = vector.shape_cast %435 : vector<16x128xf32> to vector<1x16x128xf32>
    %437 = vector.broadcast %436 : vector<1x16x128xf32> to vector<2x16x128xf32>
    %438 = arith.mulf %434, %437 : vector<2x16x128xf32>
    %cst_315 = arith.constant dense<0xFF800000> : vector<2x128xf32>
    %439 = vector.multi_reduction <maximumf>, %438, %cst_315 [1] : vector<2x16x128xf32> to vector<2x128xf32>
    %c0_316 = arith.constant 0 : index
    %c0_317 = arith.constant 0 : index
    %440 = vector.load %arg7[%c0_316, %c0_317] : memref<2x128xf32, #tpu.memory_space<vmem>>, vector<2x128xf32>
    tpu.vector_store %arg7[%c0_316, %c0_317], %439 {strides = array<i32>} : memref<2x128xf32, #tpu.memory_space<vmem>>, vector<2x128xf32>,
    return
  }
  func.func @transform_1(%arg0: i32, %arg1: memref<2x16xi32, #tpu.memory_space<smem>>) -> (i32, i32) {
    %c0_i32 = arith.constant 0 : i32
    %c0_i32_0 = arith.constant 0 : i32
    %c0_i32_1 = arith.constant 0 : i32
    return %c0_i32, %c0_i32_0 : i32, i32
  }
  func.func @transform_2(%arg0: i32, %arg1: memref<2x16xi32, #tpu.memory_space<smem>>) -> (i32, i32) {
    %c0_i32 = arith.constant 0 : i32
    %c0_i32_0 = arith.constant 0 : i32
    %c0_i32_1 = arith.constant 0 : i32
    return %c0_i32, %c0_i32_0 : i32, i32
  }
  func.func @transform_3(%arg0: i32, %arg1: memref<2x16xi32, #tpu.memory_space<smem>>) -> (i32, i32) {
    %c0_i32 = arith.constant 0 : i32
    %c0_i32_0 = arith.constant 0 : i32
    %c0_i32_1 = arith.constant 0 : i32
    return %c0_i32, %c0_i32_0 : i32, i32
  }
  func.func @transform_4(%arg0: i32, %arg1: memref<2x16xi32, #tpu.memory_space<smem>>) -> (i32, i32) {
    %c0_i32 = arith.constant 0 : i32
    %c0_i32_0 = arith.constant 0 : i32
    %c0_i32_1 = arith.constant 0 : i32
    return %c0_i32, %c0_i32_0 : i32, i32
  }
  func.func @transform_5(%arg0: i32, %arg1: memref<2x16xi32, #tpu.memory_space<smem>>) -> (i32, i32) {
    %c0_i32 = arith.constant 0 : i32
    %c0_i32_0 = arith.constant 0 : i32
    return %arg0, %c0_i32 : i32, i32
  }
}

</mosaic_0001>

<bundles_post_ra>
// kernel: tpu_custom_call.1
= control target key start
LH: loop header
LB: loop body
LE: loop exit
PB: predicated region body
PF: predicated region fallthrough
CT: control target
= control target key end

     0   :  { %s2611_s0 = inlined_call_operand.vmem [shape: s32[2,16], index: 0, kind: input, shape index: {}]   ;;  %s2612_s1 = inlined_call_operand.vmem [shape: f32[50,32], index: 1, kind: input, shape index: {}]   ;;  %s2613_s2 = inlined_call_operand.vmem [shape: bf16[32,128], index: 2, kind: input, shape index: {}]   ;;  %s2614_s3 = inlined_call_operand.vmem [shape: f32[1,128], index: 3, kind: input, shape index: {}]   ;;  %s2615_s4 = inlined_call_operand.vmem [shape: f32[5,128], index: 4, kind: input, shape index: {}]   ;;  %s2616_s5 = inlined_call_operand.vmem [shape: f32[16,128], index: 5, kind: input, shape index: {}]   ;;  %s2617_s6 = inlined_call_operand.hbm [shape: f32[2,128], index: 6, kind: output, shape index: {}]  }
   0x1   :  { %s11_s23 = sshll.u32 %s2611_s0, 4  ;;  %s12_s23 = int_to_ptr.vmem [resolvable:$true] %s11_s23 }
   0x2   :  { %s2357_s24 = scalar_lea.vmem %s12_s23, 32  ;;  %p2362_p1 = scmp.lt.s32.totalorder %s12_s23, %s12_s23 }
   0x3   :  { %p2358_p0 = scmp.ne.s32.totalorder %s12_s23, %s2357_s24  ;;  %p2363_p2 = scmp.lt.s32.totalorder %s2357_s24, %s2357_s24 }
   0x5   :  { %p2364_p3 = por %p2363_p2, %p2362_p1 }
   0x7   :  { %p2365_p4 = pnand %p2364_p3, %p2358_p0 }
   0x9   :  { %2368 = shalt.err (!%p2365_p4)  }
   0xa   :  { %s2397_s25 = smov [#allocation5]  }
   0xb   :  { %14 = dma.vmem_to_smem %s12_s23, 32, %s2397_s25, [#allocation4] }
   0xc   :  { %2391 = dma.done.wait [#allocation4], 32 }
   0xd   :  { %2392 = vsyncadd [#allocation4], 4294967264 }
   0xe   :  { %16 = sfence }
   0xf   :  { %17 = vsyncpa [#allocation7], 0  ;;  %s29_s26 = sld [smem:[#allocation5]] }
  0x15   :  { %s30_s29 = scalar_lea.vmem %s2612_s1, %s29_s26 }
  0x16   :  { %v48_v0 = vld [vmem:[%s30_s29] sm:$0x1] }
  0x17   :  { %49 = vst [vmem:[#allocation2] sm:$0x1] %v48_v0 }
  0x18   :  { %74 = vsyncadd [#allocation3], 16  ;;  %s2300_s0 = sld [smem:[#allocation5 + $0x1]] }
  0x1e   :  { %s77_s8 = scalar_lea.vmem %s2612_s1, %s2300_s0 }
  0x1f   :  { %v96_v1 = vld [vmem:[%s77_s8] sm:$0x1] }
  0x20   :  { %97 = vst [vmem:[#allocation2 + $0x1] sm:$0x1] %v96_v1 }
  0x21   :  { %122 = vsyncadd [#allocation3], 16  ;;  %s2301_s9 = sld [smem:[#allocation5 + $0x2]] }
  0x27   :  { %s125_s12 = scalar_lea.vmem %s2612_s1, %s2301_s9 }
  0x28   :  { %v144_v2 = vld [vmem:[%s125_s12] sm:$0x1] }
  0x29   :  { %145 = vst [vmem:[#allocation2 + $0x2] sm:$0x1] %v144_v2 }
  0x2a   :  { %170 = vsyncadd [#allocation3], 16  ;;  %s2302_s13 = sld [smem:[#allocation5 + $0x3]] }
  0x30   :  { %s173_s16 = scalar_lea.vmem %s2612_s1, %s2302_s13 }
  0x31   :  { %v192_v3 = vld [vmem:[%s173_s16] sm:$0x1] }
  0x32   :  { %193 = vst [vmem:[#allocation2 + $0x3] sm:$0x1] %v192_v3 }
  0x33   :  { %218 = vsyncadd [#allocation3], 16  ;;  %s2303_s17 = sld [smem:[#allocation5 + $0x4]] }
  0x39   :  { %s221_s20 = scalar_lea.vmem %s2612_s1, %s2303_s17 }
  0x3a   :  { %v240_v4 = vld [vmem:[%s221_s20] sm:$0x1] }
  0x3b   :  { %241 = vst [vmem:[#allocation2 + $0x4] sm:$0x1] %v240_v4 }
  0x3c   :  { %266 = vsyncadd [#allocation3], 16  ;;  %s2304_s21 = sld [smem:[#allocation5 + $0x5]] }
  0x42   :  { %s269_s24 = scalar_lea.vmem %s2612_s1, %s2304_s21 }
  0x43   :  { %v288_v5 = vld [vmem:[%s269_s24] sm:$0x1] }
  0x44   :  { %289 = vst [vmem:[#allocation2 + $0x5] sm:$0x1] %v288_v5 }
  0x45   :  { %314 = vsyncadd [#allocation3], 16  ;;  %s2305_s25 = sld [smem:[#allocation5 + $0x6]] }
  0x4b   :  { %s317_s28 = scalar_lea.vmem %s2612_s1, %s2305_s25 }
  0x4c   :  { %v336_v6 = vld [vmem:[%s317_s28] sm:$0x1] }
  0x4d   :  { %337 = vst [vmem:[#allocation2 + $0x6] sm:$0x1] %v336_v6 }
  0x4e   :  { %362 = vsyncadd [#allocation3], 16  ;;  %s2306_s29 = sld [smem:[#allocation5 + $0x7]] }
  0x54   :  { %s365_s7 = scalar_lea.vmem %s2612_s1, %s2306_s29 }
  0x55   :  { %v384_v7 = vld [vmem:[%s365_s7] sm:$0x1] }
  0x56   :  { %385 = vst [vmem:[#allocation2 + $0x7] sm:$0x1] %v384_v7 }
  0x57   :  { %410 = vsyncadd [#allocation3], 16  ;;  %s2307_s8 = sld [smem:[#allocation5 + $0x8]] }
  0x5d   :  { %s413_s11 = scalar_lea.vmem %s2612_s1, %s2307_s8 }
  0x5e   :  { %v432_v8 = vld [vmem:[%s413_s11] sm:$0x1] }
  0x5f   :  { %433 = vst [vmem:[#allocation2 + $0x8] sm:$0x1] %v432_v8 }
  0x60   :  { %458 = vsyncadd [#allocation3], 16  ;;  %s2308_s12 = sld [smem:[#allocation5 + $0x9]] }
  0x66   :  { %s461_s15 = scalar_lea.vmem %s2612_s1, %s2308_s12 }
  0x67   :  { %v480_v9 = vld [vmem:[%s461_s15] sm:$0x1] }
  0x68   :  { %481 = vst [vmem:[#allocation2 + $0x9] sm:$0x1] %v480_v9 }
  0x69   :  { %506 = vsyncadd [#allocation3], 16  ;;  %s2309_s16 = sld [smem:[#allocation5 + $0xa]] }
  0x6f   :  { %s509_s19 = scalar_lea.vmem %s2612_s1, %s2309_s16 }
  0x70   :  { %v528_v10 = vld [vmem:[%s509_s19] sm:$0x1] }
  0x71   :  { %529 = vst [vmem:[#allocation2 + $0xa] sm:$0x1] %v528_v10 }
  0x72   :  { %554 = vsyncadd [#allocation3], 16  ;;  %s2310_s20 = sld [smem:[#allocation5 + $0xb]] }
  0x78   :  { %s557_s23 = scalar_lea.vmem %s2612_s1, %s2310_s20 }
  0x79   :  { %v576_v11 = vld [vmem:[%s557_s23] sm:$0x1] }
  0x7a   :  { %577 = vst [vmem:[#allocation2 + $0xb] sm:$0x1] %v576_v11 }
  0x7b   :  { %602 = vsyncadd [#allocation3], 16  ;;  %s2311_s24 = sld [smem:[#allocation5 + $0xc]] }
  0x81   :  { %s605_s27 = scalar_lea.vmem %s2612_s1, %s2311_s24 }
  0x82   :  { %v624_v12 = vld [vmem:[%s605_s27] sm:$0x1] }
  0x83   :  { %625 = vst [vmem:[#allocation2 + $0xc] sm:$0x1] %v624_v12 }
  0x84   :  { %650 = vsyncadd [#allocation3], 16  ;;  %s2312_s28 = sld [smem:[#allocation5 + $0xd]] }
  0x8a   :  { %s653_s30 = scalar_lea.vmem %s2612_s1, %s2312_s28 }
  0x8b   :  { %v672_v13 = vld [vmem:[%s653_s30] sm:$0x1] }
  0x8c   :  { %673 = vst [vmem:[#allocation2 + $0xd] sm:$0x1] %v672_v13 }
  0x8d   :  { %698 = vsyncadd [#allocation3], 16  ;;  %s2313_s7 = sld [smem:[#allocation5 + $0xe]] }
  0x93   :  { %s701_s10 = scalar_lea.vmem %s2612_s1, %s2313_s7 }
  0x94   :  { %v720_v14 = vld [vmem:[%s701_s10] sm:$0x1] }
  0x95   :  { %721 = vst [vmem:[#allocation2 + $0xe] sm:$0x1] %v720_v14 }
  0x96   :  { %746 = vsyncadd [#allocation3], 16  ;;  %s2314_s11 = sld [smem:[#allocation5 + $0xf]] }
  0x9c   :  { %s749_s14 = scalar_lea.vmem %s2612_s1, %s2314_s11 }
  0x9d   :  { %v768_v15 = vld [vmem:[%s749_s14] sm:$0x1] }
  0x9e   :  { %769 = vst [vmem:[#allocation2 + $0xf] sm:$0x1] %v768_v15 }
  0x9f   :  { %794 = vsyncadd [#allocation3], 16  ;;  %s2315_s15 = sld [smem:[#allocation5 + $0x80]] }
  0xa5   :  { %s798_s18 = scalar_lea.vmem %s2612_s1, %s2315_s15 }
  0xa6   :  { %v817_v16 = vld [vmem:[%s798_s18] sm:$0x1] }
  0xa7   :  { %818 = vst [vmem:[#allocation2 + $0x10] sm:$0x1] %v817_v16 }
  0xa8   :  { %843 = vsyncadd [#allocation3], 16  ;;  %s2316_s19 = sld [smem:[#allocation5 + $0x81]] }
  0xae   :  { %s846_s22 = scalar_lea.vmem %s2612_s1, %s2316_s19 }
  0xaf   :  { %v865_v17 = vld [vmem:[%s846_s22] sm:$0x1] }
  0xb0   :  { %866 = vst [vmem:[#allocation2 + $0x11] sm:$0x1] %v865_v17 }
  0xb1   :  { %891 = vsyncadd [#allocation3], 16  ;;  %s2317_s23 = sld [smem:[#allocation5 + $0x82]] }
  0xb7   :  { %s894_s26 = scalar_lea.vmem %s2612_s1, %s2317_s23 }
  0xb8   :  { %v913_v18 = vld [vmem:[%s894_s26] sm:$0x1] }
  0xb9   :  { %914 = vst [vmem:[#allocation2 + $0x12] sm:$0x1] %v913_v18 }
  0xba   :  { %939 = vsyncadd [#allocation3], 16  ;;  %s2318_s27 = sld [smem:[#allocation5 + $0x83]] }
  0xc0   :  { %s942_s0 = scalar_lea.vmem %s2612_s1, %s2318_s27 }
  0xc1   :  { %v961_v19 = vld [vmem:[%s942_s0] sm:$0x1] }
  0xc2   :  { %962 = vst [vmem:[#allocation2 + $0x13] sm:$0x1] %v961_v19 }
  0xc3   :  { %987 = vsyncadd [#allocation3], 16  ;;  %s2319_s30 = sld [smem:[#allocation5 + $0x84]] }
  0xc9   :  { %s990_s9 = scalar_lea.vmem %s2612_s1, %s2319_s30 }
  0xca   :  { %v1009_v20 = vld [vmem:[%s990_s9] sm:$0x1] }
  0xcb   :  { %1010 = vst [vmem:[#allocation2 + $0x14] sm:$0x1] %v1009_v20 }
  0xcc   :  { %1035 = vsyncadd [#allocation3], 16  ;;  %s2320_s10 = sld [smem:[#allocation5 + $0x85]] }
  0xd2   :  { %s1038_s13 = scalar_lea.vmem %s2612_s1, %s2320_s10 }
  0xd3   :  { %v1057_v21 = vld [vmem:[%s1038_s13] sm:$0x1] }
  0xd4   :  { %1058 = vst [vmem:[#allocation2 + $0x15] sm:$0x1] %v1057_v21 }
  0xd5   :  { %1083 = vsyncadd [#allocation3], 16  ;;  %s2321_s14 = sld [smem:[#allocation5 + $0x86]] }
  0xdb   :  { %s1086_s17 = scalar_lea.vmem %s2612_s1, %s2321_s14 }
  0xdc   :  { %v1105_v22 = vld [vmem:[%s1086_s17] sm:$0x1] }
  0xdd   :  { %1106 = vst [vmem:[#allocation2 + $0x16] sm:$0x1] %v1105_v22 }
  0xde   :  { %1131 = vsyncadd [#allocation3], 16  ;;  %s2322_s18 = sld [smem:[#allocation5 + $0x87]] }
  0xe4   :  { %s1134_s21 = scalar_lea.vmem %s2612_s1, %s2322_s18 }
  0xe5   :  { %v1153_v23 = vld [vmem:[%s1134_s21] sm:$0x1] }
  0xe6   :  { %1154 = vst [vmem:[#allocation2 + $0x17] sm:$0x1] %v1153_v23 }
  0xe7   :  { %1179 = vsyncadd [#allocation3], 16  ;;  %s2323_s22 = sld [smem:[#allocation5 + $0x88]] }
  0xed   :  { %s1182_s25 = scalar_lea.vmem %s2612_s1, %s2323_s22 }
  0xee   :  { %v1201_v24 = vld [vmem:[%s1182_s25] sm:$0x1] }
  0xef   :  { %1202 = vst [vmem:[#allocation2 + $0x18] sm:$0x1] %v1201_v24 }
  0xf0   :  { %1227 = vsyncadd [#allocation3], 16  ;;  %s2324_s26 = sld [smem:[#allocation5 + $0x89]] }
  0xf6   :  { %s1230_s29 = scalar_lea.vmem %s2612_s1, %s2324_s26 }
  0xf7   :  { %v1249_v25 = vld [vmem:[%s1230_s29] sm:$0x1] }
  0xf8   :  { %1250 = vst [vmem:[#allocation2 + $0x19] sm:$0x1] %v1249_v25 }
  0xf9   :  { %1275 = vsyncadd [#allocation3], 16  ;;  %s2325_s0 = sld [smem:[#allocation5 + $0x8a]] }
  0xff   :  { %s1278_s8 = scalar_lea.vmem %s2612_s1, %s2325_s0 }
 0x100   :  { %v1297_v26 = vld [vmem:[%s1278_s8] sm:$0x1] }
 0x101   :  { %1298 = vst [vmem:[#allocation2 + $0x1a] sm:$0x1] %v1297_v26 }
 0x102   :  { %1323 = vsyncadd [#allocation3], 16  ;;  %s2326_s9 = sld [smem:[#allocation5 + $0x8b]] }
 0x108   :  { %s1326_s12 = scalar_lea.vmem %s2612_s1, %s2326_s9 }
 0x109   :  { %v1345_v27 = vld [vmem:[%s1326_s12] sm:$0x1] }
 0x10a   :  { %1346 = vst [vmem:[#allocation2 + $0x1b] sm:$0x1] %v1345_v27 }
 0x10b   :  { %1371 = vsyncadd [#allocation3], 16  ;;  %s2327_s13 = sld [smem:[#allocation5 + $0x8c]] }
 0x111   :  { %s1374_s16 = scalar_lea.vmem %s2612_s1, %s2327_s13 }
 0x112   :  { %v1393_v28 = vld [vmem:[%s1374_s16] sm:$0x1] }
 0x113   :  { %1394 = vst [vmem:[#allocation2 + $0x1c] sm:$0x1] %v1393_v28 }
 0x114   :  { %1419 = vsyncadd [#allocation3], 16  ;;  %s2328_s17 = sld [smem:[#allocation5 + $0x8d]] }
 0x11a   :  { %s1422_s20 = scalar_lea.vmem %s2612_s1, %s2328_s17 }
 0x11b   :  { %v1441_v29 = vld [vmem:[%s1422_s20] sm:$0x1] }
 0x11c   :  { %1442 = vst [vmem:[#allocation2 + $0x1d] sm:$0x1] %v1441_v29 }
 0x11d   :  { %1467 = vsyncadd [#allocation3], 16  ;;  %s2329_s21 = sld [smem:[#allocation5 + $0x8e]] }
 0x123   :  { %s1470_s24 = scalar_lea.vmem %s2612_s1, %s2329_s21 }
 0x124   :  { %v1489_v30 = vld [vmem:[%s1470_s24] sm:$0x1] }
 0x125   :  { %1490 = vst [vmem:[#allocation2 + $0x1e] sm:$0x1] %v1489_v30 }
 0x126   :  { %1515 = vsyncadd [#allocation3], 16  ;;  %s2330_s25 = sld [smem:[#allocation5 + $0x8f]] }
 0x12c   :  { %s1518_s28 = scalar_lea.vmem %s2612_s1, %s2330_s25 }
 0x12d   :  { %v1537_v31 = vld [vmem:[%s1518_s28] sm:$0x1] }
 0x12e   :  { %1538 = vst [vmem:[#allocation2 + $0x1f] sm:$0x1] %v1537_v31 }
 0x12f   :  { %1563 = vsyncadd [#allocation3], 16 }
 0x130   :  { %2393 = dma.done.wait [#allocation3], 512 }
 0x131   :  { %2394 = vsyncadd [#allocation3], 4294966784  ;;  %v2355_v32 = vld [vmem:[%s2613_s2] sm:$0xff]   ;;  %v2356_v33 = vld [vmem:[%s2613_s2 + $0x8] sm:$0xff]   ;;  %vm1651_vm0 = vcmask 261120   ;;  %vm1748_vm1 = vcmask 1045504   ;;  %v1736_v12 = vlaneseq }
 0x132   :  { %2341 = vmatprep.subr.bf16.mxu0 %v2355_v32  ;;  %v1629_v34 = vld [vmem:[#allocation2] sm:$0xff]  ;;  %v1630_v35 = vld [vmem:[#allocation2 + $0x8] sm:$0xff]  ;;  %v1631_v37 = vld [vmem:[#allocation2 + $0x10] sm:$0xff]  ;;  %vm1712_vm2 = vcmask 1046528   ;;  %vm1784_vm3 = vcmask 1044480   ;;  %vm1820_vm4 = vcmask 1043456  }
 0x133   :  { %2342 = vmatpush3.bf16.msra.mxu0 %v2355_v32  ;;  %v1633_v36 = vpack.c.bf16 %v1630_v35, %v1629_v34  ;;  %s2398_s1 = smov 112   ;;  %s2399_s2 = smov 120   ;;  %v1737_v15 = vshrl.u32 %v1736_v12, 7  ;;  %v1707_v21 = vld [vmem:[%s2615_s4] sm:$0x1f]  ;;  %vm1893_vm5 = vcmask 1041409  }
 0x134   :  { %2343 = vmatprep.subr.bf16.mxu0 %v2356_v33  ;;  %s2400_s8 = smov 104   ;;  %s2401_s9 = smov 96  }
 0x135   :  { %v1632_v38 = vld [vmem:[#allocation2 + $0x18] sm:$0xff]  ;;  %2345 = vmatprep.mubr.msk.bf16.mxu0 %vm1651_vm0, %v1633_v36  ;;  %v1738_v18 = vsub.s32 1, %v1737_v15  ;;  %v1774_v25 = vsub.s32 2, %v1737_v15  ;;  %v1810_v26 = vsub.s32 3, %v1737_v15  ;;  %v1846_v30 = vsub.s32 4, %v1737_v15 }
 0x136   :  { %v1634_v39 = vpack.c.bf16 %v1632_v38, %v1631_v37 }
 0x137   :  { %2344 = vmatpush3.bf16.msra.mxu0 %v2356_v33  ;;  %v1739_v22 = vrot.slane %v1707_v21, %v1738_v18  ;;  %v1775_v31 = vrot.slane %v1707_v21, %v1774_v25  ;;  %v1811_v34 = vrot.slane %v1707_v21, %v1810_v26 }
 0x13a   :  { %2346 = vmatmul.mubr.msk.bf16.vlgmr.msra.gmra.mrb[0].mxu0 %vm1651_vm0, %v1634_v39 }
 0x20d   :  { %v2543_v40 = vpop.f32.mrb[0].mxu0 }
 0x20e   :  { %v2545_v41 = vpop.f32.mrb[1].mxu0  ;;  %v1752_v42 = vrot.slane %v2543_v40, 2  ;;  %v1716_v43 = vrot.slane %v2543_v40, 1  ;;  %v1788_v44 = vrot.slane %v2543_v40, 3  ;;  %v1824_v2 = vrot.slane %v2543_v40, 4 }
 0x20f   :  { %v2550_v45 = vpop.f32.mrb[2].mxu0  ;;  %v1713_v46 = vrot.slane %v2545_v41, 1  ;;  %v1749_v47 = vrot.slane %v2545_v41, 2  ;;  %v1785_v48 = vrot.slane %v2545_v41, 3  ;;  %v1821_v49 = vrot.slane %v2545_v41, 4 }
 0x210   :  { %v2556_v50 = vpop.f32.mrb[3].mxu0  ;;  %v1754_v51 = vrot.slane %v2550_v45, 2  ;;  %v1718_v52 = vrot.slane %v2550_v45, 1  ;;  %v1790_v53 = vrot.slane %v2550_v45, 3  ;;  %v1826_v54 = vrot.slane %v2550_v45, 4 }
 0x211   :  { %v1714_v55 = vrot.slane %v2556_v50, 1  ;;  %v1750_v56 = vrot.slane %v2556_v50, 2  ;;  %v1786_v57 = vrot.slane %v2556_v50, 3  ;;  %v1822_v58 = vrot.slane %v2556_v50, 4 }
 0x212   :  { %v1755_v59 = vsel %vm1748_vm1, %v1752_v42, %v1754_v51  ;;  %v1719_v60 = vsel %vm1712_vm2, %v1716_v43, %v1718_v52  ;;  %v1791_v61 = vsel %vm1784_vm3, %v1788_v44, %v1790_v53  ;;  %v1722_v62 = vsel %vm1712_vm2, %v1718_v52, %v1713_v46 }
 0x213   :  { %1764 = vrot.lane.b32.xlu0 %v1755_v59, %s2398_s1  ;;  %1728 = vrot.lane.b32.xlu1 %v1719_v60, %s2399_s2  ;;  %v1758_v63 = vsel %vm1748_vm1, %v1754_v51, %v1749_v47  ;;  %v1715_v0 = vsel %vm1712_vm2, %v1713_v46, %v1714_v55  ;;  %v1794_v1 = vsel %vm1784_vm3, %v1790_v53, %v1785_v48 }
 0x214   :  { %v1717_v3 = vsel %vm1712_vm2, %v1714_v55, %v1716_v43  ;;  %v1753_v4 = vsel %vm1748_vm1, %v1750_v56, %v1752_v42  ;;  %v1751_v5 = vsel %vm1748_vm1, %v1749_v47, %v1750_v56  ;;  %v1789_v6 = vsel %vm1784_vm3, %v1786_v57, %v1788_v44 }
 0x215   :  { %v1787_v7 = vsel %vm1784_vm3, %v1785_v48, %v1786_v57  ;;  %v1825_v8 = vsel %vm1820_vm4, %v1822_v58, %v1824_v2  ;;  %v1823_v9 = vsel %vm1820_vm4, %v1821_v49, %v1822_v58  ;;  %v1830_v10 = vsel %vm1820_vm4, %v1826_v54, %v1821_v49 }
 0x216   :  { %v1827_v11 = vsel %vm1820_vm4, %v1824_v2, %v1826_v54  ;;  %v1847_v43 = vrot.slane %v1707_v21, %v1846_v30 }
 0x217   :  { %1800 = vrot.lane.b32.xlu0 %v1791_v61, %s2400_s8  ;;  %1730 = vrot.lane.b32.xlu1 %v1722_v62, %s2399_s2 }
 0x21b   :  { %1766 = vrot.lane.b32.xlu1 %v1758_v63, %s2398_s1  ;;  %1724 = vrot.lane.b32.xlu0 %v1715_v0, %s2399_s2 }
 0x21f   :  { %1802 = vrot.lane.b32.xlu1 %v1794_v1, %s2400_s8  ;;  %1726 = vrot.lane.b32.xlu0 %v1717_v3, %s2399_s2 }
 0x223   :  { %1762 = vrot.lane.b32.xlu1 %v1753_v4, %s2398_s1  ;;  %1760 = vrot.lane.b32.xlu0 %v1751_v5, %s2398_s1 }
 0x227   :  { %1798 = vrot.lane.b32.xlu1 %v1789_v6, %s2400_s8  ;;  %1796 = vrot.lane.b32.xlu0 %v1787_v7, %s2400_s8 }
 0x22b   :  { %1834 = vrot.lane.b32.xlu1 %v1825_v8, %s2401_s9  ;;  %1832 = vrot.lane.b32.xlu0 %v1823_v9, %s2401_s9  ;;  %v1872_v8 = vld [vmem:[%s2616_s5 + $0x8] sm:$0xff]  ;;  %v1871_v9 = vld [vmem:[%s2616_s5] sm:$0xff] }
 0x22f   :  { %1838 = vrot.lane.b32.xlu1 %v1830_v10, %s2401_s9  ;;  %1836 = vrot.lane.b32.xlu0 %v1827_v11, %s2401_s9 }
 0x285   :  { %v1765_v13 = vpop.permute.xlu0 %1764  ;;  %v1729_v14 = vpop.permute.xlu1 %1728 }
 0x286   :  { %v1742_v27 = vmul.f32 %v1739_v22, %v1729_v14  ;;  %v1778_v49 = vmul.f32 %v1775_v31, %v1765_v13 }
 0x288   :  { %v1746_v37 = vadd.f32 %v2543_v40, %v1742_v27 }
 0x289   :  { %v1801_v16 = vpop.permute.xlu0 %1800  ;;  %v1731_v17 = vpop.permute.xlu1 %1730 }
 0x28a   :  { %v1743_v38 = vmul.f32 %v1739_v22, %v1731_v17  ;;  %v1782_v54 = vadd.f32 %v1778_v49, %v1746_v37  ;;  %v1814_v55 = vmul.f32 %v1811_v34, %v1801_v16 }
 0x28c   :  { %v1747_v56 = vadd.f32 %v2550_v45, %v1743_v38  ;;  %v1818_v1 = vadd.f32 %v1814_v55, %v1782_v54 }
 0x28d   :  { %v1767_v19 = vpop.permute.xlu1 %1766  ;;  %v1725_v20 = vpop.permute.xlu0 %1724 }
 0x28e   :  { %v1740_v32 = vmul.f32 %v1739_v22, %v1725_v20  ;;  %v1779_v51 = vmul.f32 %v1775_v31, %v1767_v19 }
 0x290   :  { %v1744_v44 = vadd.f32 %v1740_v32, %v2545_v41  ;;  %v1783_v41 = vadd.f32 %v1779_v51, %v1747_v56 }
 0x291   :  { %v1803_v23 = vpop.permute.xlu1 %1802  ;;  %v1727_v24 = vpop.permute.xlu0 %1726 }
 0x292   :  { %v1741_v33 = vmul.f32 %v1739_v22, %v1727_v24  ;;  %v1815_v57 = vmul.f32 %v1811_v34, %v1803_v23 }
 0x294   :  { %v1745_v46 = vadd.f32 %v1741_v33, %v2556_v50  ;;  %v2335_v50 = vld [vmem:[%s2614_s3] ss:$0 sm:$0xff]  ;;  %v1819_v2 = vadd.f32 %v1815_v57, %v1783_v41  ;;  %s2402_s3 = smov [#allocation6]  }
 0x295   :  { %v1763_v28 = vpop.permute.xlu1 %1762  ;;  %v1761_v29 = vpop.permute.xlu0 %1760  ;;  %s1903_s5 = sshll.u32 %s2402_s3, 4  ;;  %s1904_s5 = int_to_ptr.vmem [resolvable:$true] %s1903_s5 }
 0x296   :  { %v1777_v35 = vmul.f32 %v1775_v31, %v1763_v28  ;;  %v1776_v36 = vmul.f32 %v1775_v31, %v1761_v29  ;;  %s2369_s17 = scalar_lea.vmem %s1904_s5, 32  ;;  %p2374_p6 = scmp.lt.s32.totalorder %s1904_s5, %s1904_s5 }
 0x297   :  { %p2370_p5 = scmp.ne.s32.totalorder %s1904_s5, %s2369_s17  ;;  %p2375_p7 = scmp.lt.s32.totalorder %s2369_s17, %s2369_s17 }
 0x298   :  { %v1781_v52 = vadd.f32 %v1777_v35, %v1745_v46  ;;  %v1780_v53 = vadd.f32 %v1776_v36, %v1744_v44 }
 0x299   :  { %v1799_v39 = vpop.permute.xlu1 %1798  ;;  %v1797_v42 = vpop.permute.xlu0 %1796  ;;  %p2376_p8 = por %p2375_p7, %p2374_p6 }
 0x29a   :  { %v1813_v47 = vmul.f32 %v1811_v34, %v1799_v39  ;;  %v1812_v48 = vmul.f32 %v1811_v34, %v1797_v42 }
 0x29b   :  { %p2377_p9 = pnand %p2376_p8, %p2370_p5 }
 0x29c   :  { %v1817_v59 = vadd.f32 %v1813_v47, %v1781_v52  ;;  %v1816_v60 = vadd.f32 %v1812_v48, %v1780_v53 }
 0x29d   :  { %v1835_v40 = vpop.permute.xlu1 %1834  ;;  %v1833_v58 = vpop.permute.xlu0 %1832 }
 0x29e   :  { %v1849_v61 = vmul.f32 %v1847_v43, %v1835_v40  ;;  %v1848_v62 = vmul.f32 %v1847_v43, %v1833_v58 }
 0x2a0   :  { %v1853_v63 = vadd.f32 %v1849_v61, %v1817_v59  ;;  %v1852_v0 = vadd.f32 %v1848_v62, %v1816_v60 }
 0x2a1   :  { %v1839_v3 = vpop.permute.xlu1 %1838  ;;  %v1837_v4 = vpop.permute.xlu0 %1836 }
 0x2a2   :  { %v1864_v5 = vadd.f32 %v2335_v50, %v1853_v63  ;;  %v1863_v45 = vadd.f32 %v2335_v50, %v1852_v0  ;;  %v1851_v6 = vmul.f32 %v1847_v43, %v1839_v3  ;;  %v1850_v7 = vmul.f32 %v1847_v43, %v1837_v4 }
 0x2a4   :  { %v1868_v10 = vmax.f32 %v1864_v5, 0.0  ;;  %v1867_v11 = vmax.f32 %v1863_v45, 0.0  ;;  %v1855_v12 = vadd.f32 %v1851_v6, %v1819_v2  ;;  %v1854_v13 = vadd.f32 %v1850_v7, %v1818_v1 }
 0x2a6   :  { %v1874_v14 = vmul.f32 %v1872_v8, %v1868_v10  ;;  %v1873_v15 = vmul.f32 %v1871_v9, %v1867_v11  ;;  %v1866_v16 = vadd.f32 %v2335_v50, %v1855_v12  ;;  %v1865_v17 = vadd.f32 %v2335_v50, %v1854_v13 }
 0x2a8   :  { %v1877_v18 = vmax.f32 %v1873_v15, %v1874_v14  ;;  %v1870_v19 = vmax.f32 %v1866_v16, 0.0  ;;  %v1869_v20 = vmax.f32 %v1865_v17, 0.0 }
 0x2aa   :  { %v1878_v21 = vrot.slane %v1877_v18, 4  ;;  %v1876_v22 = vmul.f32 %v1872_v8, %v1870_v19  ;;  %v1875_v23 = vmul.f32 %v1871_v9, %v1869_v20 }
 0x2ac   :  { %v1879_v24 = vmax.f32 %v1877_v18, %v1878_v21  ;;  %v1884_v25 = vmax.f32 %v1875_v23, %v1876_v22 }
 0x2ae   :  { %v1885_v26 = vrot.slane %v1884_v25, 4  ;;  %v1880_v27 = vrot.slane %v1879_v24, 2 }
 0x2b0   :  { %v1886_v28 = vmax.f32 %v1884_v25, %v1885_v26  ;;  %v1881_v29 = vmax.f32 %v1879_v24, %v1880_v27 }
 0x2b2   :  { %v1887_v30 = vrot.slane %v1886_v28, 2  ;;  %v1882_v31 = vrot.slane %v1881_v29, 1 }
 0x2b4   :  { %v1888_v32 = vmax.f32 %v1886_v28, %v1887_v30  ;;  %v1883_v34 = vmax.f32 %v1881_v29, %v1882_v31 }
 0x2b6   :  { %v1889_v33 = vrot.slane %v1888_v32, 1 }
 0x2b8   :  { %v1890_v35 = vmax.f32 %v1888_v32, %v1889_v33 }
 0x2ba   :  { %v1894_v36 = vsel %vm1893_vm5, %v1890_v35, %v1883_v34 }
 0x2bb   :  { %1896 = vst [vmem:[#allocation6] sm:$0x3] %v1894_v36 }
 0x2bc   :  { %2380 = shalt.err (!%p2377_p9)
}
 0x2bd   :  { %s2381_s20 = scalar_lea.hbm %s2617_s6, 32 }
 0x2be   :  { %p2382_p10 = scmp.ne.s32.totalorder %s2617_s6, %s2381_s20  ;;  %p2385_p11 = scmp.lt.u32.totalorder %s2381_s20, %s2617_s6 }
 0x2c0   :  { %p2387_p12 = pnand %p2385_p11, %p2382_p10 }
 0x2c2   :  { %2390 = shalt.err (!%p2387_p12)
}
 0x2c3   :  { %1906 = dma.vmem_to_hbm [thread:$0]  %s1904_s5, 32, %s2617_s6, [#allocation7]  }
 0x2c4   :  { %2395 = dma.done.wait [#allocation7], 32  }
 0x2c5   :  { %2396 = vsyncadd [#allocation7], 4294967264 }
 0x2c6   :  { %1910 = vsyncpa [#allocation7], 1 }
 0x2c7   :  { %1911 = vsyncmov [#allocation3] }
 0x2ca   :  { %s1912_s27 = vpop.sfrf %1911 }
 0x2cb   :  { %p2336_p13 = scmp.ne.s32.totalorder %s1912_s27, 0 }
 0x2cd   :  { %1916 = shalt.err (%p2336_p13)  }

</bundles_post_ra>
